<compile_context>
chip_gen: v6e
topology: v6e:2x2x1
jax: 0.10.0
libtpu: 0.0.40
codegen_flags: <defaults>
</compile_context>

<pallas_src>
import jax
import jax.numpy as jnp
from jax.experimental import pallas as pl
from jax.experimental.pallas import tpu as pltpu  # noqa: F401  (kept for TPU backend)

# ----- small, BERT-like config -----
B = 2            # batch
S = 8            # sequence length
H = 32           # hidden size
NH = 2           # attention heads
DH = H // NH     # head dim
I = 64           # ffn intermediate size
L = 2            # encoder layers
V = 100          # vocab size
HH = 256         # classifier hidden (nn.Linear(hidden, 256))
LN_EPS = 1e-12
OUT_LANES = 128  # lane-dense output block width


# ---------------- in-kernel helpers (traced jnp, run on VPU/EUP/MXU) ----------------
def _layernorm(x, g, b):
    mu = jnp.mean(x, axis=-1, keepdims=True)
    var = jnp.mean((x - mu) ** 2, axis=-1, keepdims=True)
    return (x - mu) * jax.lax.rsqrt(var + LN_EPS) * g + b


def _gelu(x):
    # tanh approximation of GELU
    # TODO(synk): HF BERT uses exact erf GELU; tanh approx differs by ~1e-3 rel.
    c = 0.7978845608028654  # sqrt(2/pi)
    return 0.5 * x * (1.0 + jnp.tanh(c * (x + 0.044715 * x * x * x)))


# ---------------- fused forward kernel (single invocation, no grid) ----------------
def fused_forward_kernel(
        x_emb_ref, addm_ref, emb_g_ref, emb_b_ref,
        wq_ref, wk_ref, wv_ref, bq_ref, bk_ref, bv_ref,
        wo_ref, bo_ref, ln1g_ref, ln1b_ref,
        w1_ref, b1_ref, w2_ref, b2_ref, ln2g_ref, ln2b_ref,
        wh_ref, bh_ref, wc_ref, bc_ref,
        o_ref):
    # embedding LayerNorm
    x = _layernorm(x_emb_ref[...], emb_g_ref[...], emb_b_ref[...])      # (B*S, H) f32

    # additive mask: (B, S) -> (B, 1, S), computed once, reused by every layer/head
    addm = addm_ref[...][:, None, :]

    # ---- encoder layers: static unroll, weights indexed by static layer id ----
    for l in range(L):
        attn = bo_ref[l]                                     # (1, H), broadcasts below
        for h in range(NH):                                  # static unroll over heads
            # per-head projections: plain 2-D dots, no lane slicing
            # (1/sqrt(DH) already folded into wq at init time)
            qh = (jnp.dot(x, wq_ref[l, h], preferred_element_type=jnp.float32)
                  + bq_ref[l, h]).reshape(B, S, DH)
            kh = (jnp.dot(x, wk_ref[l, h], preferred_element_type=jnp.float32)
                  + bk_ref[l, h]).reshape(B, S, DH)
            vh = (jnp.dot(x, wv_ref[l, h], preferred_element_type=jnp.float32)
                  + bv_ref[l, h]).reshape(B, S, DH)

            s = jnp.einsum('bqd,bkd->bqk', qh, kh,
                           preferred_element_type=jnp.float32) + addm   # (B, S, S)
            s = s - jnp.max(s, axis=-1, keepdims=True)
            p = jnp.exp(s)
            p = p * pl.reciprocal(jnp.sum(p, axis=-1, keepdims=True), approx=True)

            ctx = jnp.einsum('bqk,bkd->bqd', p, vh,
                             preferred_element_type=jnp.float32).reshape(B * S, DH)
            # per-head output projection accumulates straight into the residual branch:
            # no lane-axis concatenation needed.
            attn = attn + jnp.dot(ctx, wo_ref[l, h],
                                  preferred_element_type=jnp.float32)   # (B*S, H)

        # residual + LN, GELU-FFN, residual + LN (post-LN BERT layer)
        h1 = _layernorm(x + attn, ln1g_ref[l], ln1b_ref[l])             # (B*S, H)
        ff = _gelu(jnp.dot(h1, w1_ref[l], preferred_element_type=jnp.float32)
                   + b1_ref[l])
        ff = jnp.dot(ff, w2_ref[l], preferred_element_type=jnp.float32) + b2_ref[l]
        x = _layernorm(h1 + ff, ln2g_ref[l], ln2b_ref[l])

    # ---- classifier head (dropout(0.3) is identity at inference) ----
    cls = x.reshape(B, S, H)[:, 0, :]                        # last_hidden_state[:, 0, :]
    hid = jnp.maximum(
        jnp.dot(cls, wh_ref[...], preferred_element_type=jnp.float32) + bh_ref[...],
        0.0)                                                 # ReLU, (B, HH)
    # (256 -> 1) linear as a VPU reduction instead of an N=1 MXU pass
    logit = jnp.sum(hid * wc_ref[...], axis=-1, keepdims=True) + bc_ref[...]   # (B, 1)
    # lane-dense store: fill the whole 128-lane block (wrapper reads column 0)
    o_ref[...] = jnp.broadcast_to(logit, (B, OUT_LANES))


# ---------------- wrapper ----------------
def tcm_classifier_forward(params, input_ids, attention_mask):
    # glue: embedding gather (token + position + token-type) in plain JAX
    tok = jnp.take(params['tok_emb'], input_ids, axis=0)              # (B, S, H)
    pos = params['pos_emb'][None, :, :]                                # (1, S, H)
    typ = params['typ_emb'][0][None, None, :]                          # all type-ids = 0
    x = (tok + pos + typ).astype(jnp.float32).reshape(B * S, H)        # 2-D activations

    # additive attention mask, 2-D: 0 where attended, -1e9 where padded
    addm = (1.0 - attention_mask.astype(jnp.float32)) * (-1e9)         # (B, S)

    out = pl.pallas_call(
        fused_forward_kernel,
        out_shape=jax.ShapeDtypeStruct((B, OUT_LANES), jnp.float32),
    )(x, addm,
      params['emb_ln_g'], params['emb_ln_b'],
      params['wq'], params['wk'], params['wv'],
      params['bq'], params['bk'], params['bv'],
      params['wo'], params['bo'],
      params['ln1_g'], params['ln1_b'],
      params['w1'], params['b1'], params['w2'], params['b2'],
      params['ln2_g'], params['ln2_b'],
      params['w_hidden'], params['b_hidden'],
      params['wc_row'], params['b_cls'])

    return out[:, 0]                                                   # (B,)


def init_params(key):
    def dense(k, shape):
        return jax.random.normal(k, shape, jnp.float32) * 0.02

    keys = jax.random.split(key, 6)
    lk = jax.random.split(keys[5], 6)
    scale = 1.0 / (DH ** 0.5)

    params = {
        'tok_emb': dense(keys[0], (V, H)),
        'pos_emb': dense(keys[1], (S, H)),
        'typ_emb': dense(keys[2], (2, H)),
        'emb_ln_g': jnp.ones((1, H), jnp.float32),
        'emb_ln_b': jnp.zeros((1, H), jnp.float32),
        # per-layer, per-head attention weights (leading (L, NH) axes, split in wrapper);
        # 1/sqrt(DH) folded into the Q projection (weights AND bias) at init time.
        'wq': dense(lk[0], (L, NH, H, DH)) * scale,
        'wk': dense(lk[1], (L, NH, H, DH)),
        'wv': dense(lk[2], (L, NH, H, DH)),
        'bq': jnp.zeros((L, NH, 1, DH), jnp.float32) * scale,
        'bk': jnp.zeros((L, NH, 1, DH), jnp.float32),
        'bv': jnp.zeros((L, NH, 1, DH), jnp.float32),
        'wo': dense(lk[3], (L, NH, DH, H)),
        'bo': jnp.zeros((L, 1, H), jnp.float32),
        'ln1_g': jnp.ones((L, 1, H), jnp.float32),
        'ln1_b': jnp.zeros((L, 1, H), jnp.float32),
        'w1': dense(lk[4], (L, H, I)),
        'b1': jnp.zeros((L, 1, I), jnp.float32),
        'w2': dense(lk[5], (L, I, H)),
        'b2': jnp.zeros((L, 1, H), jnp.float32),
        'ln2_g': jnp.ones((L, 1, H), jnp.float32),
        'ln2_b': jnp.zeros((L, 1, H), jnp.float32),
        # classifier head: nn.Linear(H, 256) and nn.Linear(256, 1)
        'w_hidden': dense(keys[3], (H, HH)),
        'b_hidden': jnp.zeros((1, HH), jnp.float32),
        'wc_row': dense(keys[4], (1, HH)),          # (256,1) weight stored transposed
        'b_cls': jnp.zeros((1, 1), jnp.float32),
    }
    return params


if __name__ == "__main__":
    root = jax.random.PRNGKey(0)
    pkey, ikey = jax.random.split(root)
    params = init_params(pkey)

    input_ids = jax.random.randint(ikey, (B, S), 0, V, dtype=jnp.int32)
    attention_mask = jnp.ones((B, S), dtype=jnp.int32)

    fwd = jax.jit(tcm_classifier_forward)
    logits = fwd(params, input_ids, attention_mask)
    jax.block_until_ready(logits)

    assert logits.shape == (B,), logits.shape
    assert logits.dtype == jnp.float32
    assert bool(jnp.all(jnp.isfinite(logits)))
    print("KERNEL_OK")
</pallas_src>

<mosaic_0001>
module attributes {stable_mosaic.version = 11 : i64} {
  func.func @fused_forward_kernel(%arg0: memref<16x32xf32, #tpu.memory_space<vmem>>, %arg1: memref<2x8xf32, #tpu.memory_space<vmem>>, %arg2: memref<1x32xf32, #tpu.memory_space<vmem>>, %arg3: memref<1x32xf32, #tpu.memory_space<vmem>>, %arg4: memref<2x2x32x16xf32, #tpu.memory_space<vmem>>, %arg5: memref<2x2x32x16xf32, #tpu.memory_space<vmem>>, %arg6: memref<2x2x32x16xf32, #tpu.memory_space<vmem>>, %arg7: memref<2x2x1x16xf32, #tpu.memory_space<vmem>>, %arg8: memref<2x2x1x16xf32, #tpu.memory_space<vmem>>, %arg9: memref<2x2x1x16xf32, #tpu.memory_space<vmem>>, %arg10: memref<2x2x16x32xf32, #tpu.memory_space<vmem>>, %arg11: memref<2x1x32xf32, #tpu.memory_space<vmem>>, %arg12: memref<2x1x32xf32, #tpu.memory_space<vmem>>, %arg13: memref<2x1x32xf32, #tpu.memory_space<vmem>>, %arg14: memref<2x32x64xf32, #tpu.memory_space<vmem>>, %arg15: memref<2x1x64xf32, #tpu.memory_space<vmem>>, %arg16: memref<2x64x32xf32, #tpu.memory_space<vmem>>, %arg17: memref<2x1x32xf32, #tpu.memory_space<vmem>>, %arg18: memref<2x1x32xf32, #tpu.memory_space<vmem>>, %arg19: memref<2x1x32xf32, #tpu.memory_space<vmem>>, %arg20: memref<32x256xf32, #tpu.memory_space<vmem>>, %arg21: memref<1x256xf32, #tpu.memory_space<vmem>>, %arg22: memref<1x256xf32, #tpu.memory_space<vmem>>, %arg23: memref<1x1xf32, #tpu.memory_space<vmem>>, %arg24: memref<2x128xf32, #tpu.memory_space<vmem>>) attributes {dimension_semantics = [], scalar_prefetch = 0 : i64, scratch_operands = 0 : i64, tpu.core_type = #tpu.core_type<tc>} {
    %c0 = arith.constant 0 : index
    %c0_0 = arith.constant 0 : index
    %0 = vector.load %arg0[%c0, %c0_0] : memref<16x32xf32, #tpu.memory_space<vmem>>, vector<16x32xf32>
    %c0_1 = arith.constant 0 : index
    %c0_2 = arith.constant 0 : index
    %1 = vector.load %arg2[%c0_1, %c0_2] : memref<1x32xf32, #tpu.memory_space<vmem>>, vector<1x32xf32>
    %c0_3 = arith.constant 0 : index
    %c0_4 = arith.constant 0 : index
    %2 = vector.load %arg3[%c0_3, %c0_4] : memref<1x32xf32, #tpu.memory_space<vmem>>, vector<1x32xf32>
    %cst = arith.constant dense<0.000000e+00> : vector<16xf32>
    %3 = vector.multi_reduction <add>, %0, %cst [1] : vector<16x32xf32> to vector<16xf32>
    %4 = vector.shape_cast %3 : vector<16xf32> to vector<16x1xf32>
    %cst_5 = arith.constant 3.200000e+01 : f32
    %5 = vector.broadcast %cst_5 : f32 to vector<16x1xf32>
    %6 = arith.divf %4, %5 : vector<16x1xf32>
    %7 = vector.broadcast %6 : vector<16x1xf32> to vector<16x32xf32>
    %8 = arith.subf %0, %7 : vector<16x32xf32>
    %9 = arith.mulf %8, %8 : vector<16x32xf32>
    %cst_6 = arith.constant dense<0.000000e+00> : vector<16xf32>
    %10 = vector.multi_reduction <add>, %9, %cst_6 [1] : vector<16x32xf32> to vector<16xf32>
    %11 = vector.shape_cast %10 : vector<16xf32> to vector<16x1xf32>
    %cst_7 = arith.constant 3.200000e+01 : f32
    %12 = vector.broadcast %cst_7 : f32 to vector<16x1xf32>
    %13 = arith.divf %11, %12 : vector<16x1xf32>
    %14 = vector.broadcast %6 : vector<16x1xf32> to vector<16x32xf32>
    %15 = arith.subf %0, %14 : vector<16x32xf32>
    %cst_8 = arith.constant 9.99999996E-13 : f32
    %16 = vector.broadcast %cst_8 : f32 to vector<16x1xf32>
    %17 = arith.addf %13, %16 : vector<16x1xf32>
    %18 = math.rsqrt %17 : vector<16x1xf32>
    %19 = vector.broadcast %18 : vector<16x1xf32> to vector<16x32xf32>
    %20 = arith.mulf %15, %19 : vector<16x32xf32>
    %21 = vector.broadcast %1 : vector<1x32xf32> to vector<16x32xf32>
    %22 = arith.mulf %20, %21 : vector<16x32xf32>
    %23 = vector.broadcast %2 : vector<1x32xf32> to vector<16x32xf32>
    %24 = arith.addf %22, %23 : vector<16x32xf32>
    %c0_9 = arith.constant 0 : index
    %c0_10 = arith.constant 0 : index
    %25 = vector.load %arg1[%c0_9, %c0_10] : memref<2x8xf32, #tpu.memory_space<vmem>>, vector<2x8xf32>
    %26 = vector.shape_cast %25 : vector<2x8xf32> to vector<2x1x8xf32>
    %c0_11 = arith.constant 0 : index
    %c0_12 = arith.constant 0 : index
    %c0_13 = arith.constant 0 : index
    %27 = vector.load %arg11[%c0_11, %c0_12, %c0_13] : memref<2x1x32xf32, #tpu.memory_space<vmem>>, vector<1x1x32xf32>
    %28 = vector.shape_cast %27 : vector<1x1x32xf32> to vector<1x32xf32>
    %c0_14 = arith.constant 0 : index
    %c0_15 = arith.constant 0 : index
    %c0_16 = arith.constant 0 : index
    %c0_17 = arith.constant 0 : index
    %29 = vector.load %arg4[%c0_14, %c0_15, %c0_16, %c0_17] : memref<2x2x32x16xf32, #tpu.memory_space<vmem>>, vector<1x1x32x16xf32>
    %30 = vector.shape_cast %29 : vector<1x1x32x16xf32> to vector<32x16xf32>
    %cst_18 = arith.constant dense<0.000000e+00> : vector<16x16xf32>
    %31 = tpu.matmul %24, %30, %cst_18 {dimension_numbers = #tpu.dot_dimension_numbers<[1], [0], [0], [1], [0, 0, 1, 1], [], []>} : vector<16x32xf32>, vector<32x16xf32>, vector<16x16xf32> -> vector<16x16xf32>
    %c0_19 = arith.constant 0 : index
    %c0_20 = arith.constant 0 : index
    %c0_21 = arith.constant 0 : index
    %c0_22 = arith.constant 0 : index
    %32 = vector.load %arg7[%c0_19, %c0_20, %c0_21, %c0_22] : memref<2x2x1x16xf32, #tpu.memory_space<vmem>>, vector<1x1x1x16xf32>
    %33 = vector.shape_cast %32 : vector<1x1x1x16xf32> to vector<1x16xf32>
    %34 = vector.broadcast %33 : vector<1x16xf32> to vector<16x16xf32>
    %35 = arith.addf %31, %34 : vector<16x16xf32>
    %36 = vector.shape_cast %35 : vector<16x16xf32> to vector<2x8x16xf32>
    %c0_23 = arith.constant 0 : index
    %c0_24 = arith.constant 0 : index
    %c0_25 = arith.constant 0 : index
    %c0_26 = arith.constant 0 : index
    %37 = vector.load %arg5[%c0_23, %c0_24, %c0_25, %c0_26] : memref<2x2x32x16xf32, #tpu.memory_space<vmem>>, vector<1x1x32x16xf32>
    %38 = vector.shape_cast %37 : vector<1x1x32x16xf32> to vector<32x16xf32>
    %cst_27 = arith.constant dense<0.000000e+00> : vector<16x16xf32>
    %39 = tpu.matmul %24, %38, %cst_27 {dimension_numbers = #tpu.dot_dimension_numbers<[1], [0], [0], [1], [0, 0, 1, 1], [], []>} : vector<16x32xf32>, vector<32x16xf32>, vector<16x16xf32> -> vector<16x16xf32>
    %c0_28 = arith.constant 0 : index
    %c0_29 = arith.constant 0 : index
    %c0_30 = arith.constant 0 : index
    %c0_31 = arith.constant 0 : index
    %40 = vector.load %arg8[%c0_28, %c0_29, %c0_30, %c0_31] : memref<2x2x1x16xf32, #tpu.memory_space<vmem>>, vector<1x1x1x16xf32>
    %41 = vector.shape_cast %40 : vector<1x1x1x16xf32> to vector<1x16xf32>
    %42 = vector.broadcast %41 : vector<1x16xf32> to vector<16x16xf32>
    %43 = arith.addf %39, %42 : vector<16x16xf32>
    %44 = vector.shape_cast %43 : vector<16x16xf32> to vector<2x8x16xf32>
    %c0_32 = arith.constant 0 : index
    %c0_33 = arith.constant 0 : index
    %c0_34 = arith.constant 0 : index
    %c0_35 = arith.constant 0 : index
    %45 = vector.load %arg6[%c0_32, %c0_33, %c0_34, %c0_35] : memref<2x2x32x16xf32, #tpu.memory_space<vmem>>, vector<1x1x32x16xf32>
    %46 = vector.shape_cast %45 : vector<1x1x32x16xf32> to vector<32x16xf32>
    %cst_36 = arith.constant dense<0.000000e+00> : vector<16x16xf32>
    %47 = tpu.matmul %24, %46, %cst_36 {dimension_numbers = #tpu.dot_dimension_numbers<[1], [0], [0], [1], [0, 0, 1, 1], [], []>} : vector<16x32xf32>, vector<32x16xf32>, vector<16x16xf32> -> vector<16x16xf32>
    %c0_37 = arith.constant 0 : index
    %c0_38 = arith.constant 0 : index
    %c0_39 = arith.constant 0 : index
    %c0_40 = arith.constant 0 : index
    %48 = vector.load %arg9[%c0_37, %c0_38, %c0_39, %c0_40] : memref<2x2x1x16xf32, #tpu.memory_space<vmem>>, vector<1x1x1x16xf32>
    %49 = vector.shape_cast %48 : vector<1x1x1x16xf32> to vector<1x16xf32>
    %50 = vector.broadcast %49 : vector<1x16xf32> to vector<16x16xf32>
    %51 = arith.addf %47, %50 : vector<16x16xf32>
    %52 = vector.shape_cast %51 : vector<16x16xf32> to vector<2x8x16xf32>
    "tpu.trace_start"() <{level = 10 : i32, message = "bqd,bkd->bqk"}> : () -> ()
    %cst_41 = arith.constant dense<0.000000e+00> : vector<2x8x8xf32>
    %53 = tpu.matmul %36, %44, %cst_41 {dimension_numbers = #tpu.dot_dimension_numbers<[2], [2], [1], [1], [0, 0, 0, 1, 1, 1], [0], [0]>} : vector<2x8x16xf32>, vector<2x8x16xf32>, vector<2x8x8xf32> -> vector<2x8x8xf32>
    "tpu.trace_stop"() : () -> ()
    %54 = vector.broadcast %26 : vector<2x1x8xf32> to vector<2x8x8xf32>
    %55 = arith.addf %53, %54 : vector<2x8x8xf32>
    %cst_42 = arith.constant dense<0xFF800000> : vector<2x8xf32>
    %56 = vector.multi_reduction <maximumf>, %55, %cst_42 [2] : vector<2x8x8xf32> to vector<2x8xf32>
    %57 = vector.shape_cast %56 : vector<2x8xf32> to vector<2x8x1xf32>
    %58 = vector.broadcast %57 : vector<2x8x1xf32> to vector<2x8x8xf32>
    %59 = arith.subf %55, %58 : vector<2x8x8xf32>
    %60 = math.exp %59 : vector<2x8x8xf32>
    %cst_43 = arith.constant dense<0.000000e+00> : vector<2x8xf32>
    %61 = vector.multi_reduction <add>, %60, %cst_43 [2] : vector<2x8x8xf32> to vector<2x8xf32>
    %62 = vector.shape_cast %61 : vector<2x8xf32> to vector<2x8x1xf32>
    %63 = tpu.reciprocal %62 {approx = true} : vector<2x8x1xf32> -> vector<2x8x1xf32>
    %64 = vector.broadcast %63 : vector<2x8x1xf32> to vector<2x8x8xf32>
    %65 = arith.mulf %60, %64 : vector<2x8x8xf32>
    "tpu.trace_start"() <{level = 10 : i32, message = "bqk,bkd->bqd"}> : () -> ()
    %cst_44 = arith.constant dense<0.000000e+00> : vector<2x8x16xf32>
    %66 = tpu.matmul %65, %52, %cst_44 {dimension_numbers = #tpu.dot_dimension_numbers<[2], [1], [1], [2], [0, 0, 0, 1, 1, 2], [0], [0]>} : vector<2x8x8xf32>, vector<2x8x16xf32>, vector<2x8x16xf32> -> vector<2x8x16xf32>
    "tpu.trace_stop"() : () -> ()
    %67 = vector.shape_cast %66 : vector<2x8x16xf32> to vector<16x16xf32>
    %c0_45 = arith.constant 0 : index
    %c0_46 = arith.constant 0 : index
    %c0_47 = arith.constant 0 : index
    %c0_48 = arith.constant 0 : index
    %68 = vector.load %arg10[%c0_45, %c0_46, %c0_47, %c0_48] : memref<2x2x16x32xf32, #tpu.memory_space<vmem>>, vector<1x1x16x32xf32>
    %69 = vector.shape_cast %68 : vector<1x1x16x32xf32> to vector<16x32xf32>
    %cst_49 = arith.constant dense<0.000000e+00> : vector<16x32xf32>
    %70 = tpu.matmul %67, %69, %cst_49 {dimension_numbers = #tpu.dot_dimension_numbers<[1], [0], [0], [1], [0, 0, 1, 1], [], []>} : vector<16x16xf32>, vector<16x32xf32>, vector<16x32xf32> -> vector<16x32xf32>
    %71 = vector.broadcast %28 : vector<1x32xf32> to vector<16x32xf32>
    %72 = arith.addf %71, %70 : vector<16x32xf32>
    %c0_50 = arith.constant 0 : index
    %c1 = arith.constant 1 : index
    %c0_51 = arith.constant 0 : index
    %c0_52 = arith.constant 0 : index
    %73 = vector.load %arg4[%c0_50, %c1, %c0_51, %c0_52] : memref<2x2x32x16xf32, #tpu.memory_space<vmem>>, vector<1x1x32x16xf32>
    %74 = vector.shape_cast %73 : vector<1x1x32x16xf32> to vector<32x16xf32>
    %cst_53 = arith.constant dense<0.000000e+00> : vector<16x16xf32>
    %75 = tpu.matmul %24, %74, %cst_53 {dimension_numbers = #tpu.dot_dimension_numbers<[1], [0], [0], [1], [0, 0, 1, 1], [], []>} : vector<16x32xf32>, vector<32x16xf32>, vector<16x16xf32> -> vector<16x16xf32>
    %c0_54 = arith.constant 0 : index
    %c1_55 = arith.constant 1 : index
    %c0_56 = arith.constant 0 : index
    %c0_57 = arith.constant 0 : index
    %76 = vector.load %arg7[%c0_54, %c1_55, %c0_56, %c0_57] : memref<2x2x1x16xf32, #tpu.memory_space<vmem>>, vector<1x1x1x16xf32>
    %77 = vector.shape_cast %76 : vector<1x1x1x16xf32> to vector<1x16xf32>
    %78 = vector.broadcast %77 : vector<1x16xf32> to vector<16x16xf32>
    %79 = arith.addf %75, %78 : vector<16x16xf32>
    %80 = vector.shape_cast %79 : vector<16x16xf32> to vector<2x8x16xf32>
    %c0_58 = arith.constant 0 : index
    %c1_59 = arith.constant 1 : index
    %c0_60 = arith.constant 0 : index
    %c0_61 = arith.constant 0 : index
    %81 = vector.load %arg5[%c0_58, %c1_59, %c0_60, %c0_61] : memref<2x2x32x16xf32, #tpu.memory_space<vmem>>, vector<1x1x32x16xf32>
    %82 = vector.shape_cast %81 : vector<1x1x32x16xf32> to vector<32x16xf32>
    %cst_62 = arith.constant dense<0.000000e+00> : vector<16x16xf32>
    %83 = tpu.matmul %24, %82, %cst_62 {dimension_numbers = #tpu.dot_dimension_numbers<[1], [0], [0], [1], [0, 0, 1, 1], [], []>} : vector<16x32xf32>, vector<32x16xf32>, vector<16x16xf32> -> vector<16x16xf32>
    %c0_63 = arith.constant 0 : index
    %c1_64 = arith.constant 1 : index
    %c0_65 = arith.constant 0 : index
    %c0_66 = arith.constant 0 : index
    %84 = vector.load %arg8[%c0_63, %c1_64, %c0_65, %c0_66] : memref<2x2x1x16xf32, #tpu.memory_space<vmem>>, vector<1x1x1x16xf32>
    %85 = vector.shape_cast %84 : vector<1x1x1x16xf32> to vector<1x16xf32>
    %86 = vector.broadcast %85 : vector<1x16xf32> to vector<16x16xf32>
    %87 = arith.addf %83, %86 : vector<16x16xf32>
    %88 = vector.shape_cast %87 : vector<16x16xf32> to vector<2x8x16xf32>
    %c0_67 = arith.constant 0 : index
    %c1_68 = arith.constant 1 : index
    %c0_69 = arith.constant 0 : index
    %c0_70 = arith.constant 0 : index
    %89 = vector.load %arg6[%c0_67, %c1_68, %c0_69, %c0_70] : memref<2x2x32x16xf32, #tpu.memory_space<vmem>>, vector<1x1x32x16xf32>
    %90 = vector.shape_cast %89 : vector<1x1x32x16xf32> to vector<32x16xf32>
    %cst_71 = arith.constant dense<0.000000e+00> : vector<16x16xf32>
    %91 = tpu.matmul %24, %90, %cst_71 {dimension_numbers = #tpu.dot_dimension_numbers<[1], [0], [0], [1], [0, 0, 1, 1], [], []>} : vector<16x32xf32>, vector<32x16xf32>, vector<16x16xf32> -> vector<16x16xf32>
    %c0_72 = arith.constant 0 : index
    %c1_73 = arith.constant 1 : index
    %c0_74 = arith.constant 0 : index
    %c0_75 = arith.constant 0 : index
    %92 = vector.load %arg9[%c0_72, %c1_73, %c0_74, %c0_75] : memref<2x2x1x16xf32, #tpu.memory_space<vmem>>, vector<1x1x1x16xf32>
    %93 = vector.shape_cast %92 : vector<1x1x1x16xf32> to vector<1x16xf32>
    %94 = vector.broadcast %93 : vector<1x16xf32> to vector<16x16xf32>
    %95 = arith.addf %91, %94 : vector<16x16xf32>
    %96 = vector.shape_cast %95 : vector<16x16xf32> to vector<2x8x16xf32>
    "tpu.trace_start"() <{level = 10 : i32, message = "bqd,bkd->bqk"}> : () -> ()
    %cst_76 = arith.constant dense<0.000000e+00> : vector<2x8x8xf32>
    %97 = tpu.matmul %80, %88, %cst_76 {dimension_numbers = #tpu.dot_dimension_numbers<[2], [2], [1], [1], [0, 0, 0, 1, 1, 1], [0], [0]>} : vector<2x8x16xf32>, vector<2x8x16xf32>, vector<2x8x8xf32> -> vector<2x8x8xf32>
    "tpu.trace_stop"() : () -> ()
    %98 = vector.broadcast %26 : vector<2x1x8xf32> to vector<2x8x8xf32>
    %99 = arith.addf %97, %98 : vector<2x8x8xf32>
    %cst_77 = arith.constant dense<0xFF800000> : vector<2x8xf32>
    %100 = vector.multi_reduction <maximumf>, %99, %cst_77 [2] : vector<2x8x8xf32> to vector<2x8xf32>
    %101 = vector.shape_cast %100 : vector<2x8xf32> to vector<2x8x1xf32>
    %102 = vector.broadcast %101 : vector<2x8x1xf32> to vector<2x8x8xf32>
    %103 = arith.subf %99, %102 : vector<2x8x8xf32>
    %104 = math.exp %103 : vector<2x8x8xf32>
    %cst_78 = arith.constant dense<0.000000e+00> : vector<2x8xf32>
    %105 = vector.multi_reduction <add>, %104, %cst_78 [2] : vector<2x8x8xf32> to vector<2x8xf32>
    %106 = vector.shape_cast %105 : vector<2x8xf32> to vector<2x8x1xf32>
    %107 = tpu.reciprocal %106 {approx = true} : vector<2x8x1xf32> -> vector<2x8x1xf32>
    %108 = vector.broadcast %107 : vector<2x8x1xf32> to vector<2x8x8xf32>
    %109 = arith.mulf %104, %108 : vector<2x8x8xf32>
    "tpu.trace_start"() <{level = 10 : i32, message = "bqk,bkd->bqd"}> : () -> ()
    %cst_79 = arith.constant dense<0.000000e+00> : vector<2x8x16xf32>
    %110 = tpu.matmul %109, %96, %cst_79 {dimension_numbers = #tpu.dot_dimension_numbers<[2], [1], [1], [2], [0, 0, 0, 1, 1, 2], [0], [0]>} : vector<2x8x8xf32>, vector<2x8x16xf32>, vector<2x8x16xf32> -> vector<2x8x16xf32>
    "tpu.trace_stop"() : () -> ()
    %111 = vector.shape_cast %110 : vector<2x8x16xf32> to vector<16x16xf32>
    %c0_80 = arith.constant 0 : index
    %c1_81 = arith.constant 1 : index
    %c0_82 = arith.constant 0 : index
    %c0_83 = arith.constant 0 : index
    %112 = vector.load %arg10[%c0_80, %c1_81, %c0_82, %c0_83] : memref<2x2x16x32xf32, #tpu.memory_space<vmem>>, vector<1x1x16x32xf32>
    %113 = vector.shape_cast %112 : vector<1x1x16x32xf32> to vector<16x32xf32>
    %cst_84 = arith.constant dense<0.000000e+00> : vector<16x32xf32>
    %114 = tpu.matmul %111, %113, %cst_84 {dimension_numbers = #tpu.dot_dimension_numbers<[1], [0], [0], [1], [0, 0, 1, 1], [], []>} : vector<16x16xf32>, vector<16x32xf32>, vector<16x32xf32> -> vector<16x32xf32>
    %115 = arith.addf %72, %114 : vector<16x32xf32>
    %116 = arith.addf %24, %115 : vector<16x32xf32>
    %c0_85 = arith.constant 0 : index
    %c0_86 = arith.constant 0 : index
    %c0_87 = arith.constant 0 : index
    %117 = vector.load %arg12[%c0_85, %c0_86, %c0_87] : memref<2x1x32xf32, #tpu.memory_space<vmem>>, vector<1x1x32xf32>
    %118 = vector.shape_cast %117 : vector<1x1x32xf32> to vector<1x32xf32>
    %c0_88 = arith.constant 0 : index
    %c0_89 = arith.constant 0 : index
    %c0_90 = arith.constant 0 : index
    %119 = vector.load %arg13[%c0_88, %c0_89, %c0_90] : memref<2x1x32xf32, #tpu.memory_space<vmem>>, vector<1x1x32xf32>
    %120 = vector.shape_cast %119 : vector<1x1x32xf32> to vector<1x32xf32>
    %cst_91 = arith.constant dense<0.000000e+00> : vector<16xf32>
    %121 = vector.multi_reduction <add>, %116, %cst_91 [1] : vector<16x32xf32> to vector<16xf32>
    %122 = vector.shape_cast %121 : vector<16xf32> to vector<16x1xf32>
    %cst_92 = arith.constant 3.200000e+01 : f32
    %123 = vector.broadcast %cst_92 : f32 to vector<16x1xf32>
    %124 = arith.divf %122, %123 : vector<16x1xf32>
    %125 = vector.broadcast %124 : vector<16x1xf32> to vector<16x32xf32>
    %126 = arith.subf %116, %125 : vector<16x32xf32>
    %127 = arith.mulf %126, %126 : vector<16x32xf32>
    %cst_93 = arith.constant dense<0.000000e+00> : vector<16xf32>
    %128 = vector.multi_reduction <add>, %127, %cst_93 [1] : vector<16x32xf32> to vector<16xf32>
    %129 = vector.shape_cast %128 : vector<16xf32> to vector<16x1xf32>
    %cst_94 = arith.constant 3.200000e+01 : f32
    %130 = vector.broadcast %cst_94 : f32 to vector<16x1xf32>
    %131 = arith.divf %129, %130 : vector<16x1xf32>
    %132 = vector.broadcast %124 : vector<16x1xf32> to vector<16x32xf32>
    %133 = arith.subf %116, %132 : vector<16x32xf32>
    %cst_95 = arith.constant 9.99999996E-13 : f32
    %134 = vector.broadcast %cst_95 : f32 to vector<16x1xf32>
    %135 = arith.addf %131, %134 : vector<16x1xf32>
    %136 = math.rsqrt %135 : vector<16x1xf32>
    %137 = vector.broadcast %136 : vector<16x1xf32> to vector<16x32xf32>
    %138 = arith.mulf %133, %137 : vector<16x32xf32>
    %139 = vector.broadcast %118 : vector<1x32xf32> to vector<16x32xf32>
    %140 = arith.mulf %138, %139 : vector<16x32xf32>
    %141 = vector.broadcast %120 : vector<1x32xf32> to vector<16x32xf32>
    %142 = arith.addf %140, %141 : vector<16x32xf32>
    %c0_96 = arith.constant 0 : index
    %c0_97 = arith.constant 0 : index
    %c0_98 = arith.constant 0 : index
    %143 = vector.load %arg14[%c0_96, %c0_97, %c0_98] : memref<2x32x64xf32, #tpu.memory_space<vmem>>, vector<1x32x64xf32>
    %144 = vector.shape_cast %143 : vector<1x32x64xf32> to vector<32x64xf32>
    %cst_99 = arith.constant dense<0.000000e+00> : vector<16x64xf32>
    %145 = tpu.matmul %142, %144, %cst_99 {dimension_numbers = #tpu.dot_dimension_numbers<[1], [0], [0], [1], [0, 0, 1, 1], [], []>} : vector<16x32xf32>, vector<32x64xf32>, vector<16x64xf32> -> vector<16x64xf32>
    %c0_100 = arith.constant 0 : index
    %c0_101 = arith.constant 0 : index
    %c0_102 = arith.constant 0 : index
    %146 = vector.load %arg15[%c0_100, %c0_101, %c0_102] : memref<2x1x64xf32, #tpu.memory_space<vmem>>, vector<1x1x64xf32>
    %147 = vector.shape_cast %146 : vector<1x1x64xf32> to vector<1x64xf32>
    %148 = vector.broadcast %147 : vector<1x64xf32> to vector<16x64xf32>
    %149 = arith.addf %145, %148 : vector<16x64xf32>
    %cst_103 = arith.constant 5.000000e-01 : f32
    %150 = vector.broadcast %cst_103 : f32 to vector<16x64xf32>
    %151 = arith.mulf %150, %149 : vector<16x64xf32>
    %cst_104 = arith.constant 4.471500e-02 : f32
    %152 = vector.broadcast %cst_104 : f32 to vector<16x64xf32>
    %153 = arith.mulf %152, %149 : vector<16x64xf32>
    %154 = arith.mulf %153, %149 : vector<16x64xf32>
    %155 = arith.mulf %154, %149 : vector<16x64xf32>
    %156 = arith.addf %149, %155 : vector<16x64xf32>
    %cst_105 = arith.constant 0.797884583 : f32
    %157 = vector.broadcast %cst_105 : f32 to vector<16x64xf32>
    %158 = arith.mulf %157, %156 : vector<16x64xf32>
    %159 = math.tanh %158 : vector<16x64xf32>
    %cst_106 = arith.constant 1.000000e+00 : f32
    %160 = vector.broadcast %cst_106 : f32 to vector<16x64xf32>
    %161 = arith.addf %160, %159 : vector<16x64xf32>
    %162 = arith.mulf %151, %161 : vector<16x64xf32>
    %c0_107 = arith.constant 0 : index
    %c0_108 = arith.constant 0 : index
    %c0_109 = arith.constant 0 : index
    %163 = vector.load %arg16[%c0_107, %c0_108, %c0_109] : memref<2x64x32xf32, #tpu.memory_space<vmem>>, vector<1x64x32xf32>
    %164 = vector.shape_cast %163 : vector<1x64x32xf32> to vector<64x32xf32>
    %cst_110 = arith.constant dense<0.000000e+00> : vector<16x32xf32>
    %165 = tpu.matmul %162, %164, %cst_110 {dimension_numbers = #tpu.dot_dimension_numbers<[1], [0], [0], [1], [0, 0, 1, 1], [], []>} : vector<16x64xf32>, vector<64x32xf32>, vector<16x32xf32> -> vector<16x32xf32>
    %c0_111 = arith.constant 0 : index
    %c0_112 = arith.constant 0 : index
    %c0_113 = arith.constant 0 : index
    %166 = vector.load %arg17[%c0_111, %c0_112, %c0_113] : memref<2x1x32xf32, #tpu.memory_space<vmem>>, vector<1x1x32xf32>
    %167 = vector.shape_cast %166 : vector<1x1x32xf32> to vector<1x32xf32>
    %168 = vector.broadcast %167 : vector<1x32xf32> to vector<16x32xf32>
    %169 = arith.addf %165, %168 : vector<16x32xf32>
    %170 = arith.addf %142, %169 : vector<16x32xf32>
    %c0_114 = arith.constant 0 : index
    %c0_115 = arith.constant 0 : index
    %c0_116 = arith.constant 0 : index
    %171 = vector.load %arg18[%c0_114, %c0_115, %c0_116] : memref<2x1x32xf32, #tpu.memory_space<vmem>>, vector<1x1x32xf32>
    %172 = vector.shape_cast %171 : vector<1x1x32xf32> to vector<1x32xf32>
    %c0_117 = arith.constant 0 : index
    %c0_118 = arith.constant 0 : index
    %c0_119 = arith.constant 0 : index
    %173 = vector.load %arg19[%c0_117, %c0_118, %c0_119] : memref<2x1x32xf32, #tpu.memory_space<vmem>>, vector<1x1x32xf32>
    %174 = vector.shape_cast %173 : vector<1x1x32xf32> to vector<1x32xf32>
    %cst_120 = arith.constant dense<0.000000e+00> : vector<16xf32>
    %175 = vector.multi_reduction <add>, %170, %cst_120 [1] : vector<16x32xf32> to vector<16xf32>
    %176 = vector.shape_cast %175 : vector<16xf32> to vector<16x1xf32>
    %cst_121 = arith.constant 3.200000e+01 : f32
    %177 = vector.broadcast %cst_121 : f32 to vector<16x1xf32>
    %178 = arith.divf %176, %177 : vector<16x1xf32>
    %179 = vector.broadcast %178 : vector<16x1xf32> to vector<16x32xf32>
    %180 = arith.subf %170, %179 : vector<16x32xf32>
    %181 = arith.mulf %180, %180 : vector<16x32xf32>
    %cst_122 = arith.constant dense<0.000000e+00> : vector<16xf32>
    %182 = vector.multi_reduction <add>, %181, %cst_122 [1] : vector<16x32xf32> to vector<16xf32>
    %183 = vector.shape_cast %182 : vector<16xf32> to vector<16x1xf32>
    %cst_123 = arith.constant 3.200000e+01 : f32
    %184 = vector.broadcast %cst_123 : f32 to vector<16x1xf32>
    %185 = arith.divf %183, %184 : vector<16x1xf32>
    %186 = vector.broadcast %178 : vector<16x1xf32> to vector<16x32xf32>
    %187 = arith.subf %170, %186 : vector<16x32xf32>
    %cst_124 = arith.constant 9.99999996E-13 : f32
    %188 = vector.broadcast %cst_124 : f32 to vector<16x1xf32>
    %189 = arith.addf %185, %188 : vector<16x1xf32>
    %190 = math.rsqrt %189 : vector<16x1xf32>
    %191 = vector.broadcast %190 : vector<16x1xf32> to vector<16x32xf32>
    %192 = arith.mulf %187, %191 : vector<16x32xf32>
    %193 = vector.broadcast %172 : vector<1x32xf32> to vector<16x32xf32>
    %194 = arith.mulf %192, %193 : vector<16x32xf32>
    %195 = vector.broadcast %174 : vector<1x32xf32> to vector<16x32xf32>
    %196 = arith.addf %194, %195 : vector<16x32xf32>
    %c1_125 = arith.constant 1 : index
    %c0_126 = arith.constant 0 : index
    %c0_127 = arith.constant 0 : index
    %197 = vector.load %arg11[%c1_125, %c0_126, %c0_127] : memref<2x1x32xf32, #tpu.memory_space<vmem>>, vector<1x1x32xf32>
    %198 = vector.shape_cast %197 : vector<1x1x32xf32> to vector<1x32xf32>
    %c1_128 = arith.constant 1 : index
    %c0_129 = arith.constant 0 : index
    %c0_130 = arith.constant 0 : index
    %c0_131 = arith.constant 0 : index
    %199 = vector.load %arg4[%c1_128, %c0_129, %c0_130, %c0_131] : memref<2x2x32x16xf32, #tpu.memory_space<vmem>>, vector<1x1x32x16xf32>
    %200 = vector.shape_cast %199 : vector<1x1x32x16xf32> to vector<32x16xf32>
    %cst_132 = arith.constant dense<0.000000e+00> : vector<16x16xf32>
    %201 = tpu.matmul %196, %200, %cst_132 {dimension_numbers = #tpu.dot_dimension_numbers<[1], [0], [0], [1], [0, 0, 1, 1], [], []>} : vector<16x32xf32>, vector<32x16xf32>, vector<16x16xf32> -> vector<16x16xf32>
    %c1_133 = arith.constant 1 : index
    %c0_134 = arith.constant 0 : index
    %c0_135 = arith.constant 0 : index
    %c0_136 = arith.constant 0 : index
    %202 = vector.load %arg7[%c1_133, %c0_134, %c0_135, %c0_136] : memref<2x2x1x16xf32, #tpu.memory_space<vmem>>, vector<1x1x1x16xf32>
    %203 = vector.shape_cast %202 : vector<1x1x1x16xf32> to vector<1x16xf32>
    %204 = vector.broadcast %203 : vector<1x16xf32> to vector<16x16xf32>
    %205 = arith.addf %201, %204 : vector<16x16xf32>
    %206 = vector.shape_cast %205 : vector<16x16xf32> to vector<2x8x16xf32>
    %c1_137 = arith.constant 1 : index
    %c0_138 = arith.constant 0 : index
    %c0_139 = arith.constant 0 : index
    %c0_140 = arith.constant 0 : index
    %207 = vector.load %arg5[%c1_137, %c0_138, %c0_139, %c0_140] : memref<2x2x32x16xf32, #tpu.memory_space<vmem>>, vector<1x1x32x16xf32>
    %208 = vector.shape_cast %207 : vector<1x1x32x16xf32> to vector<32x16xf32>
    %cst_141 = arith.constant dense<0.000000e+00> : vector<16x16xf32>
    %209 = tpu.matmul %196, %208, %cst_141 {dimension_numbers = #tpu.dot_dimension_numbers<[1], [0], [0], [1], [0, 0, 1, 1], [], []>} : vector<16x32xf32>, vector<32x16xf32>, vector<16x16xf32> -> vector<16x16xf32>
    %c1_142 = arith.constant 1 : index
    %c0_143 = arith.constant 0 : index
    %c0_144 = arith.constant 0 : index
    %c0_145 = arith.constant 0 : index
    %210 = vector.load %arg8[%c1_142, %c0_143, %c0_144, %c0_145] : memref<2x2x1x16xf32, #tpu.memory_space<vmem>>, vector<1x1x1x16xf32>
    %211 = vector.shape_cast %210 : vector<1x1x1x16xf32> to vector<1x16xf32>
    %212 = vector.broadcast %211 : vector<1x16xf32> to vector<16x16xf32>
    %213 = arith.addf %209, %212 : vector<16x16xf32>
    %214 = vector.shape_cast %213 : vector<16x16xf32> to vector<2x8x16xf32>
    %c1_146 = arith.constant 1 : index
    %c0_147 = arith.constant 0 : index
    %c0_148 = arith.constant 0 : index
    %c0_149 = arith.constant 0 : index
    %215 = vector.load %arg6[%c1_146, %c0_147, %c0_148, %c0_149] : memref<2x2x32x16xf32, #tpu.memory_space<vmem>>, vector<1x1x32x16xf32>
    %216 = vector.shape_cast %215 : vector<1x1x32x16xf32> to vector<32x16xf32>
    %cst_150 = arith.constant dense<0.000000e+00> : vector<16x16xf32>
    %217 = tpu.matmul %196, %216, %cst_150 {dimension_numbers = #tpu.dot_dimension_numbers<[1], [0], [0], [1], [0, 0, 1, 1], [], []>} : vector<16x32xf32>, vector<32x16xf32>, vector<16x16xf32> -> vector<16x16xf32>
    %c1_151 = arith.constant 1 : index
    %c0_152 = arith.constant 0 : index
    %c0_153 = arith.constant 0 : index
    %c0_154 = arith.constant 0 : index
    %218 = vector.load %arg9[%c1_151, %c0_152, %c0_153, %c0_154] : memref<2x2x1x16xf32, #tpu.memory_space<vmem>>, vector<1x1x1x16xf32>
    %219 = vector.shape_cast %218 : vector<1x1x1x16xf32> to vector<1x16xf32>
    %220 = vector.broadcast %219 : vector<1x16xf32> to vector<16x16xf32>
    %221 = arith.addf %217, %220 : vector<16x16xf32>
    %222 = vector.shape_cast %221 : vector<16x16xf32> to vector<2x8x16xf32>
    "tpu.trace_start"() <{level = 10 : i32, message = "bqd,bkd->bqk"}> : () -> ()
    %cst_155 = arith.constant dense<0.000000e+00> : vector<2x8x8xf32>
    %223 = tpu.matmul %206, %214, %cst_155 {dimension_numbers = #tpu.dot_dimension_numbers<[2], [2], [1], [1], [0, 0, 0, 1, 1, 1], [0], [0]>} : vector<2x8x16xf32>, vector<2x8x16xf32>, vector<2x8x8xf32> -> vector<2x8x8xf32>
    "tpu.trace_stop"() : () -> ()
    %224 = vector.broadcast %26 : vector<2x1x8xf32> to vector<2x8x8xf32>
    %225 = arith.addf %223, %224 : vector<2x8x8xf32>
    %cst_156 = arith.constant dense<0xFF800000> : vector<2x8xf32>
    %226 = vector.multi_reduction <maximumf>, %225, %cst_156 [2] : vector<2x8x8xf32> to vector<2x8xf32>
    %227 = vector.shape_cast %226 : vector<2x8xf32> to vector<2x8x1xf32>
    %228 = vector.broadcast %227 : vector<2x8x1xf32> to vector<2x8x8xf32>
    %229 = arith.subf %225, %228 : vector<2x8x8xf32>
    %230 = math.exp %229 : vector<2x8x8xf32>
    %cst_157 = arith.constant dense<0.000000e+00> : vector<2x8xf32>
    %231 = vector.multi_reduction <add>, %230, %cst_157 [2] : vector<2x8x8xf32> to vector<2x8xf32>
    %232 = vector.shape_cast %231 : vector<2x8xf32> to vector<2x8x1xf32>
    %233 = tpu.reciprocal %232 {approx = true} : vector<2x8x1xf32> -> vector<2x8x1xf32>
    %234 = vector.broadcast %233 : vector<2x8x1xf32> to vector<2x8x8xf32>
    %235 = arith.mulf %230, %234 : vector<2x8x8xf32>
    "tpu.trace_start"() <{level = 10 : i32, message = "bqk,bkd->bqd"}> : () -> ()
    %cst_158 = arith.constant dense<0.000000e+00> : vector<2x8x16xf32>
    %236 = tpu.matmul %235, %222, %cst_158 {dimension_numbers = #tpu.dot_dimension_numbers<[2], [1], [1], [2], [0, 0, 0, 1, 1, 2], [0], [0]>} : vector<2x8x8xf32>, vector<2x8x16xf32>, vector<2x8x16xf32> -> vector<2x8x16xf32>
    "tpu.trace_stop"() : () -> ()
    %237 = vector.shape_cast %236 : vector<2x8x16xf32> to vector<16x16xf32>
    %c1_159 = arith.constant 1 : index
    %c0_160 = arith.constant 0 : index
    %c0_161 = arith.constant 0 : index
    %c0_162 = arith.constant 0 : index
    %238 = vector.load %arg10[%c1_159, %c0_160, %c0_161, %c0_162] : memref<2x2x16x32xf32, #tpu.memory_space<vmem>>, vector<1x1x16x32xf32>
    %239 = vector.shape_cast %238 : vector<1x1x16x32xf32> to vector<16x32xf32>
    %cst_163 = arith.constant dense<0.000000e+00> : vector<16x32xf32>
    %240 = tpu.matmul %237, %239, %cst_163 {dimension_numbers = #tpu.dot_dimension_numbers<[1], [0], [0], [1], [0, 0, 1, 1], [], []>} : vector<16x16xf32>, vector<16x32xf32>, vector<16x32xf32> -> vector<16x32xf32>
    %241 = vector.broadcast %198 : vector<1x32xf32> to vector<16x32xf32>
    %242 = arith.addf %241, %240 : vector<16x32xf32>
    %c1_164 = arith.constant 1 : index
    %c1_165 = arith.constant 1 : index
    %c0_166 = arith.constant 0 : index
    %c0_167 = arith.constant 0 : index
    %243 = vector.load %arg4[%c1_164, %c1_165, %c0_166, %c0_167] : memref<2x2x32x16xf32, #tpu.memory_space<vmem>>, vector<1x1x32x16xf32>
    %244 = vector.shape_cast %243 : vector<1x1x32x16xf32> to vector<32x16xf32>
    %cst_168 = arith.constant dense<0.000000e+00> : vector<16x16xf32>
    %245 = tpu.matmul %196, %244, %cst_168 {dimension_numbers = #tpu.dot_dimension_numbers<[1], [0], [0], [1], [0, 0, 1, 1], [], []>} : vector<16x32xf32>, vector<32x16xf32>, vector<16x16xf32> -> vector<16x16xf32>
    %c1_169 = arith.constant 1 : index
    %c1_170 = arith.constant 1 : index
    %c0_171 = arith.constant 0 : index
    %c0_172 = arith.constant 0 : index
    %246 = vector.load %arg7[%c1_169, %c1_170, %c0_171, %c0_172] : memref<2x2x1x16xf32, #tpu.memory_space<vmem>>, vector<1x1x1x16xf32>
    %247 = vector.shape_cast %246 : vector<1x1x1x16xf32> to vector<1x16xf32>
    %248 = vector.broadcast %247 : vector<1x16xf32> to vector<16x16xf32>
    %249 = arith.addf %245, %248 : vector<16x16xf32>
    %250 = vector.shape_cast %249 : vector<16x16xf32> to vector<2x8x16xf32>
    %c1_173 = arith.constant 1 : index
    %c1_174 = arith.constant 1 : index
    %c0_175 = arith.constant 0 : index
    %c0_176 = arith.constant 0 : index
    %251 = vector.load %arg5[%c1_173, %c1_174, %c0_175, %c0_176] : memref<2x2x32x16xf32, #tpu.memory_space<vmem>>, vector<1x1x32x16xf32>
    %252 = vector.shape_cast %251 : vector<1x1x32x16xf32> to vector<32x16xf32>
    %cst_177 = arith.constant dense<0.000000e+00> : vector<16x16xf32>
    %253 = tpu.matmul %196, %252, %cst_177 {dimension_numbers = #tpu.dot_dimension_numbers<[1], [0], [0], [1], [0, 0, 1, 1], [], []>} : vector<16x32xf32>, vector<32x16xf32>, vector<16x16xf32> -> vector<16x16xf32>
    %c1_178 = arith.constant 1 : index
    %c1_179 = arith.constant 1 : index
    %c0_180 = arith.constant 0 : index
    %c0_181 = arith.constant 0 : index
    %254 = vector.load %arg8[%c1_178, %c1_179, %c0_180, %c0_181] : memref<2x2x1x16xf32, #tpu.memory_space<vmem>>, vector<1x1x1x16xf32>
    %255 = vector.shape_cast %254 : vector<1x1x1x16xf32> to vector<1x16xf32>
    %256 = vector.broadcast %255 : vector<1x16xf32> to vector<16x16xf32>
    %257 = arith.addf %253, %256 : vector<16x16xf32>
    %258 = vector.shape_cast %257 : vector<16x16xf32> to vector<2x8x16xf32>
    %c1_182 = arith.constant 1 : index
    %c1_183 = arith.constant 1 : index
    %c0_184 = arith.constant 0 : index
    %c0_185 = arith.constant 0 : index
    %259 = vector.load %arg6[%c1_182, %c1_183, %c0_184, %c0_185] : memref<2x2x32x16xf32, #tpu.memory_space<vmem>>, vector<1x1x32x16xf32>
    %260 = vector.shape_cast %259 : vector<1x1x32x16xf32> to vector<32x16xf32>
    %cst_186 = arith.constant dense<0.000000e+00> : vector<16x16xf32>
    %261 = tpu.matmul %196, %260, %cst_186 {dimension_numbers = #tpu.dot_dimension_numbers<[1], [0], [0], [1], [0, 0, 1, 1], [], []>} : vector<16x32xf32>, vector<32x16xf32>, vector<16x16xf32> -> vector<16x16xf32>
    %c1_187 = arith.constant 1 : index
    %c1_188 = arith.constant 1 : index
    %c0_189 = arith.constant 0 : index
    %c0_190 = arith.constant 0 : index
    %262 = vector.load %arg9[%c1_187, %c1_188, %c0_189, %c0_190] : memref<2x2x1x16xf32, #tpu.memory_space<vmem>>, vector<1x1x1x16xf32>
    %263 = vector.shape_cast %262 : vector<1x1x1x16xf32> to vector<1x16xf32>
    %264 = vector.broadcast %263 : vector<1x16xf32> to vector<16x16xf32>
    %265 = arith.addf %261, %264 : vector<16x16xf32>
    %266 = vector.shape_cast %265 : vector<16x16xf32> to vector<2x8x16xf32>
    "tpu.trace_start"() <{level = 10 : i32, message = "bqd,bkd->bqk"}> : () -> ()
    %cst_191 = arith.constant dense<0.000000e+00> : vector<2x8x8xf32>
    %267 = tpu.matmul %250, %258, %cst_191 {dimension_numbers = #tpu.dot_dimension_numbers<[2], [2], [1], [1], [0, 0, 0, 1, 1, 1], [0], [0]>} : vector<2x8x16xf32>, vector<2x8x16xf32>, vector<2x8x8xf32> -> vector<2x8x8xf32>
    "tpu.trace_stop"() : () -> ()
    %268 = vector.broadcast %26 : vector<2x1x8xf32> to vector<2x8x8xf32>
    %269 = arith.addf %267, %268 : vector<2x8x8xf32>
    %cst_192 = arith.constant dense<0xFF800000> : vector<2x8xf32>
    %270 = vector.multi_reduction <maximumf>, %269, %cst_192 [2] : vector<2x8x8xf32> to vector<2x8xf32>
    %271 = vector.shape_cast %270 : vector<2x8xf32> to vector<2x8x1xf32>
    %272 = vector.broadcast %271 : vector<2x8x1xf32> to vector<2x8x8xf32>
    %273 = arith.subf %269, %272 : vector<2x8x8xf32>
    %274 = math.exp %273 : vector<2x8x8xf32>
    %cst_193 = arith.constant dense<0.000000e+00> : vector<2x8xf32>
    %275 = vector.multi_reduction <add>, %274, %cst_193 [2] : vector<2x8x8xf32> to vector<2x8xf32>
    %276 = vector.shape_cast %275 : vector<2x8xf32> to vector<2x8x1xf32>
    %277 = tpu.reciprocal %276 {approx = true} : vector<2x8x1xf32> -> vector<2x8x1xf32>
    %278 = vector.broadcast %277 : vector<2x8x1xf32> to vector<2x8x8xf32>
    %279 = arith.mulf %274, %278 : vector<2x8x8xf32>
    "tpu.trace_start"() <{level = 10 : i32, message = "bqk,bkd->bqd"}> : () -> ()
    %cst_194 = arith.constant dense<0.000000e+00> : vector<2x8x16xf32>
    %280 = tpu.matmul %279, %266, %cst_194 {dimension_numbers = #tpu.dot_dimension_numbers<[2], [1], [1], [2], [0, 0, 0, 1, 1, 2], [0], [0]>} : vector<2x8x8xf32>, vector<2x8x16xf32>, vector<2x8x16xf32> -> vector<2x8x16xf32>
    "tpu.trace_stop"() : () -> ()
    %281 = vector.shape_cast %280 : vector<2x8x16xf32> to vector<16x16xf32>
    %c1_195 = arith.constant 1 : index
    %c1_196 = arith.constant 1 : index
    %c0_197 = arith.constant 0 : index
    %c0_198 = arith.constant 0 : index
    %282 = vector.load %arg10[%c1_195, %c1_196, %c0_197, %c0_198] : memref<2x2x16x32xf32, #tpu.memory_space<vmem>>, vector<1x1x16x32xf32>
    %283 = vector.shape_cast %282 : vector<1x1x16x32xf32> to vector<16x32xf32>
    %cst_199 = arith.constant dense<0.000000e+00> : vector<16x32xf32>
    %284 = tpu.matmul %281, %283, %cst_199 {dimension_numbers = #tpu.dot_dimension_numbers<[1], [0], [0], [1], [0, 0, 1, 1], [], []>} : vector<16x16xf32>, vector<16x32xf32>, vector<16x32xf32> -> vector<16x32xf32>
    %285 = arith.addf %242, %284 : vector<16x32xf32>
    %286 = arith.addf %196, %285 : vector<16x32xf32>
    %c1_200 = arith.constant 1 : index
    %c0_201 = arith.constant 0 : index
    %c0_202 = arith.constant 0 : index
    %287 = vector.load %arg12[%c1_200, %c0_201, %c0_202] : memref<2x1x32xf32, #tpu.memory_space<vmem>>, vector<1x1x32xf32>
    %288 = vector.shape_cast %287 : vector<1x1x32xf32> to vector<1x32xf32>
    %c1_203 = arith.constant 1 : index
    %c0_204 = arith.constant 0 : index
    %c0_205 = arith.constant 0 : index
    %289 = vector.load %arg13[%c1_203, %c0_204, %c0_205] : memref<2x1x32xf32, #tpu.memory_space<vmem>>, vector<1x1x32xf32>
    %290 = vector.shape_cast %289 : vector<1x1x32xf32> to vector<1x32xf32>
    %cst_206 = arith.constant dense<0.000000e+00> : vector<16xf32>
    %291 = vector.multi_reduction <add>, %286, %cst_206 [1] : vector<16x32xf32> to vector<16xf32>
    %292 = vector.shape_cast %291 : vector<16xf32> to vector<16x1xf32>
    %cst_207 = arith.constant 3.200000e+01 : f32
    %293 = vector.broadcast %cst_207 : f32 to vector<16x1xf32>
    %294 = arith.divf %292, %293 : vector<16x1xf32>
    %295 = vector.broadcast %294 : vector<16x1xf32> to vector<16x32xf32>
    %296 = arith.subf %286, %295 : vector<16x32xf32>
    %297 = arith.mulf %296, %296 : vector<16x32xf32>
    %cst_208 = arith.constant dense<0.000000e+00> : vector<16xf32>
    %298 = vector.multi_reduction <add>, %297, %cst_208 [1] : vector<16x32xf32> to vector<16xf32>
    %299 = vector.shape_cast %298 : vector<16xf32> to vector<16x1xf32>
    %cst_209 = arith.constant 3.200000e+01 : f32
    %300 = vector.broadcast %cst_209 : f32 to vector<16x1xf32>
    %301 = arith.divf %299, %300 : vector<16x1xf32>
    %302 = vector.broadcast %294 : vector<16x1xf32> to vector<16x32xf32>
    %303 = arith.subf %286, %302 : vector<16x32xf32>
    %cst_210 = arith.constant 9.99999996E-13 : f32
    %304 = vector.broadcast %cst_210 : f32 to vector<16x1xf32>
    %305 = arith.addf %301, %304 : vector<16x1xf32>
    %306 = math.rsqrt %305 : vector<16x1xf32>
    %307 = vector.broadcast %306 : vector<16x1xf32> to vector<16x32xf32>
    %308 = arith.mulf %303, %307 : vector<16x32xf32>
    %309 = vector.broadcast %288 : vector<1x32xf32> to vector<16x32xf32>
    %310 = arith.mulf %308, %309 : vector<16x32xf32>
    %311 = vector.broadcast %290 : vector<1x32xf32> to vector<16x32xf32>
    %312 = arith.addf %310, %311 : vector<16x32xf32>
    %c1_211 = arith.constant 1 : index
    %c0_212 = arith.constant 0 : index
    %c0_213 = arith.constant 0 : index
    %313 = vector.load %arg14[%c1_211, %c0_212, %c0_213] : memref<2x32x64xf32, #tpu.memory_space<vmem>>, vector<1x32x64xf32>
    %314 = vector.shape_cast %313 : vector<1x32x64xf32> to vector<32x64xf32>
    %cst_214 = arith.constant dense<0.000000e+00> : vector<16x64xf32>
    %315 = tpu.matmul %312, %314, %cst_214 {dimension_numbers = #tpu.dot_dimension_numbers<[1], [0], [0], [1], [0, 0, 1, 1], [], []>} : vector<16x32xf32>, vector<32x64xf32>, vector<16x64xf32> -> vector<16x64xf32>
    %c1_215 = arith.constant 1 : index
    %c0_216 = arith.constant 0 : index
    %c0_217 = arith.constant 0 : index
    %316 = vector.load %arg15[%c1_215, %c0_216, %c0_217] : memref<2x1x64xf32, #tpu.memory_space<vmem>>, vector<1x1x64xf32>
    %317 = vector.shape_cast %316 : vector<1x1x64xf32> to vector<1x64xf32>
    %318 = vector.broadcast %317 : vector<1x64xf32> to vector<16x64xf32>
    %319 = arith.addf %315, %318 : vector<16x64xf32>
    %cst_218 = arith.constant 5.000000e-01 : f32
    %320 = vector.broadcast %cst_218 : f32 to vector<16x64xf32>
    %321 = arith.mulf %320, %319 : vector<16x64xf32>
    %cst_219 = arith.constant 4.471500e-02 : f32
    %322 = vector.broadcast %cst_219 : f32 to vector<16x64xf32>
    %323 = arith.mulf %322, %319 : vector<16x64xf32>
    %324 = arith.mulf %323, %319 : vector<16x64xf32>
    %325 = arith.mulf %324, %319 : vector<16x64xf32>
    %326 = arith.addf %319, %325 : vector<16x64xf32>
    %cst_220 = arith.constant 0.797884583 : f32
    %327 = vector.broadcast %cst_220 : f32 to vector<16x64xf32>
    %328 = arith.mulf %327, %326 : vector<16x64xf32>
    %329 = math.tanh %328 : vector<16x64xf32>
    %cst_221 = arith.constant 1.000000e+00 : f32
    %330 = vector.broadcast %cst_221 : f32 to vector<16x64xf32>
    %331 = arith.addf %330, %329 : vector<16x64xf32>
    %332 = arith.mulf %321, %331 : vector<16x64xf32>
    %c1_222 = arith.constant 1 : index
    %c0_223 = arith.constant 0 : index
    %c0_224 = arith.constant 0 : index
    %333 = vector.load %arg16[%c1_222, %c0_223, %c0_224] : memref<2x64x32xf32, #tpu.memory_space<vmem>>, vector<1x64x32xf32>
    %334 = vector.shape_cast %333 : vector<1x64x32xf32> to vector<64x32xf32>
    %cst_225 = arith.constant dense<0.000000e+00> : vector<16x32xf32>
    %335 = tpu.matmul %332, %334, %cst_225 {dimension_numbers = #tpu.dot_dimension_numbers<[1], [0], [0], [1], [0, 0, 1, 1], [], []>} : vector<16x64xf32>, vector<64x32xf32>, vector<16x32xf32> -> vector<16x32xf32>
    %c1_226 = arith.constant 1 : index
    %c0_227 = arith.constant 0 : index
    %c0_228 = arith.constant 0 : index
    %336 = vector.load %arg17[%c1_226, %c0_227, %c0_228] : memref<2x1x32xf32, #tpu.memory_space<vmem>>, vector<1x1x32xf32>
    %337 = vector.shape_cast %336 : vector<1x1x32xf32> to vector<1x32xf32>
    %338 = vector.broadcast %337 : vector<1x32xf32> to vector<16x32xf32>
    %339 = arith.addf %335, %338 : vector<16x32xf32>
    %340 = arith.addf %312, %339 : vector<16x32xf32>
    %c1_229 = arith.constant 1 : index
    %c0_230 = arith.constant 0 : index
    %c0_231 = arith.constant 0 : index
    %341 = vector.load %arg18[%c1_229, %c0_230, %c0_231] : memref<2x1x32xf32, #tpu.memory_space<vmem>>, vector<1x1x32xf32>
    %342 = vector.shape_cast %341 : vector<1x1x32xf32> to vector<1x32xf32>
    %c1_232 = arith.constant 1 : index
    %c0_233 = arith.constant 0 : index
    %c0_234 = arith.constant 0 : index
    %343 = vector.load %arg19[%c1_232, %c0_233, %c0_234] : memref<2x1x32xf32, #tpu.memory_space<vmem>>, vector<1x1x32xf32>
    %344 = vector.shape_cast %343 : vector<1x1x32xf32> to vector<1x32xf32>
    %cst_235 = arith.constant dense<0.000000e+00> : vector<16xf32>
    %345 = vector.multi_reduction <add>, %340, %cst_235 [1] : vector<16x32xf32> to vector<16xf32>
    %346 = vector.shape_cast %345 : vector<16xf32> to vector<16x1xf32>
    %cst_236 = arith.constant 3.200000e+01 : f32
    %347 = vector.broadcast %cst_236 : f32 to vector<16x1xf32>
    %348 = arith.divf %346, %347 : vector<16x1xf32>
    %349 = vector.broadcast %348 : vector<16x1xf32> to vector<16x32xf32>
    %350 = arith.subf %340, %349 : vector<16x32xf32>
    %351 = arith.mulf %350, %350 : vector<16x32xf32>
    %cst_237 = arith.constant dense<0.000000e+00> : vector<16xf32>
    %352 = vector.multi_reduction <add>, %351, %cst_237 [1] : vector<16x32xf32> to vector<16xf32>
    %353 = vector.shape_cast %352 : vector<16xf32> to vector<16x1xf32>
    %cst_238 = arith.constant 3.200000e+01 : f32
    %354 = vector.broadcast %cst_238 : f32 to vector<16x1xf32>
    %355 = arith.divf %353, %354 : vector<16x1xf32>
    %356 = vector.broadcast %348 : vector<16x1xf32> to vector<16x32xf32>
    %357 = arith.subf %340, %356 : vector<16x32xf32>
    %cst_239 = arith.constant 9.99999996E-13 : f32
    %358 = vector.broadcast %cst_239 : f32 to vector<16x1xf32>
    %359 = arith.addf %355, %358 : vector<16x1xf32>
    %360 = math.rsqrt %359 : vector<16x1xf32>
    %361 = vector.broadcast %360 : vector<16x1xf32> to vector<16x32xf32>
    %362 = arith.mulf %357, %361 : vector<16x32xf32>
    %363 = vector.broadcast %342 : vector<1x32xf32> to vector<16x32xf32>
    %364 = arith.mulf %362, %363 : vector<16x32xf32>
    %365 = vector.broadcast %344 : vector<1x32xf32> to vector<16x32xf32>
    %366 = arith.addf %364, %365 : vector<16x32xf32>
    %367 = vector.shape_cast %366 : vector<16x32xf32> to vector<2x8x32xf32>
    %368 = vector.extract_strided_slice %367 {offsets = [0, 0, 0], sizes = [2, 1, 32], strides = [1, 1, 1]} : vector<2x8x32xf32> to vector<2x1x32xf32>
    %369 = vector.shape_cast %368 : vector<2x1x32xf32> to vector<2x32xf32>
    %c0_240 = arith.constant 0 : index
    %c0_241 = arith.constant 0 : index
    %370 = vector.load %arg20[%c0_240, %c0_241] : memref<32x256xf32, #tpu.memory_space<vmem>>, vector<32x256xf32>
    %cst_242 = arith.constant dense<0.000000e+00> : vector<2x256xf32>
    %371 = tpu.matmul %369, %370, %cst_242 {dimension_numbers = #tpu.dot_dimension_numbers<[1], [0], [0], [1], [0, 0, 1, 1], [], []>} : vector<2x32xf32>, vector<32x256xf32>, vector<2x256xf32> -> vector<2x256xf32>
    %c0_243 = arith.constant 0 : index
    %c0_244 = arith.constant 0 : index
    %372 = vector.load %arg21[%c0_243, %c0_244] : memref<1x256xf32, #tpu.memory_space<vmem>>, vector<1x256xf32>
    %373 = vector.broadcast %372 : vector<1x256xf32> to vector<2x256xf32>
    %374 = arith.addf %371, %373 : vector<2x256xf32>
    %cst_245 = arith.constant 0.000000e+00 : f32
    %375 = vector.broadcast %cst_245 : f32 to vector<2x256xf32>
    %376 = arith.maximumf %374, %375 : vector<2x256xf32>
    %c0_246 = arith.constant 0 : index
    %c0_247 = arith.constant 0 : index
    %377 = vector.load %arg22[%c0_246, %c0_247] : memref<1x256xf32, #tpu.memory_space<vmem>>, vector<1x256xf32>
    %378 = vector.broadcast %377 : vector<1x256xf32> to vector<2x256xf32>
    %379 = arith.mulf %376, %378 : vector<2x256xf32>
    %cst_248 = arith.constant dense<0.000000e+00> : vector<2xf32>
    %380 = vector.multi_reduction <add>, %379, %cst_248 [1] : vector<2x256xf32> to vector<2xf32>
    %381 = vector.shape_cast %380 : vector<2xf32> to vector<2x1xf32>
    %c0_249 = arith.constant 0 : index
    %c0_250 = arith.constant 0 : index
    %382 = vector.load %arg23[%c0_249, %c0_250] : memref<1x1xf32, #tpu.memory_space<vmem>>, vector<1x1xf32>
    %383 = vector.broadcast %382 : vector<1x1xf32> to vector<2x1xf32>
    %384 = arith.addf %381, %383 : vector<2x1xf32>
    %385 = vector.shape_cast %384 : vector<2x1xf32> to vector<2x1xf32>
    %386 = vector.broadcast %385 : vector<2x1xf32> to vector<2x128xf32>
    %c0_251 = arith.constant 0 : index
    %c0_252 = arith.constant 0 : index
    %387 = vector.load %arg24[%c0_251, %c0_252] : memref<2x128xf32, #tpu.memory_space<vmem>>, vector<2x128xf32>
    tpu.vector_store %arg24[%c0_251, %c0_252], %386 {strides = array<i32>} : memref<2x128xf32, #tpu.memory_space<vmem>>, vector<2x128xf32>,
    return
  }
}

</mosaic_0001>

<bundles_post_ra>
// kernel: tcm_classifier_forward.1
= control target key start
LH: loop header
LB: loop body
LE: loop exit
PB: predicated region body
PF: predicated region fallthrough
CT: control target
= control target key end

     0   :  { %vm83_vm0 = vcmask 261120   ;;  %v4289_v42 = vmov 0.0   ;;  %vm4290_vm1 = vmmov 0   ;;  %vm426_vm2 = vcmask 130048   ;;  %s5020_s0 = inlined_call_operand.vmem [shape: f32[16,32], index: 0, kind: input, shape index: {}]   ;;  %s5021_s4 = inlined_call_operand.vmem [shape: f32[2,2,32,16], index: 4, kind: input, shape index: {}]   ;;  %s5022_s5 = inlined_call_operand.vmem [shape: f32[2,2,32,16], index: 5, kind: input, shape index: {}]   ;;  %s5023_s6 = inlined_call_operand.vmem [shape: f32[2,2,32,16], index: 6, kind: input, shape index: {}]   ;;  %s5024_s2 = inlined_call_operand.vmem [shape: f32[1,32], index: 2, kind: input, shape index: {}]   ;;  %s5025_s3 = inlined_call_operand.vmem [shape: f32[1,32], index: 3, kind: input, shape index: {}]   ;;  %s5026_s8 = inlined_call_operand.vmem [shape: f32[2,2,1,16], index: 8, kind: input, shape index: {}]   ;;  %s5027_s7 = inlined_call_operand.vmem [shape: f32[2,2,1,16], index: 7, kind: input, shape index: {}]   ;;  %s5028_s9 = inlined_call_operand.vmem [shape: f32[2,2,1,16], index: 9, kind: input, shape index: {}]   ;;  %s5029_s1 = inlined_call_operand.vmem [shape: f32[2,8], index: 1, kind: input, shape index: {}]   ;;  %s5030_s10 = inlined_call_operand.vmem [shape: f32[2,2,16,32], index: 10, kind: input, shape index: {}]   ;;  %s5031_s11 = inlined_call_operand.vmem [shape: f32[2,1,32], index: 11, kind: input, shape index: {}]   ;;  %s5032_s14 = inlined_call_operand.vmem [shape: f32[2,32,64], index: 14, kind: input, shape index: {}]   ;;  %s5033_s12 = inlined_call_operand.vmem [shape: f32[2,1,32], index: 12, kind: input, shape index: {}]   ;;  %s5034_s13 = inlined_call_operand.vmem [shape: f32[2,1,32], index: 13, kind: input, shape index: {}]   ;;  %s5035_s16 = inlined_call_operand.vmem [shape: f32[2,64,32], index: 16, kind: input, shape index: {}]   ;;  %s5036_s15 = inlined_call_operand.vmem [shape: f32[2,1,64], index: 15, kind: input, shape index: {}]   ;;  %s5037_s17 = inlined_call_operand.vmem [shape: f32[2,1,32], index: 17, kind: input, shape index: {}]   ;;  %s5038_s18 = inlined_call_operand.vmem [shape: f32[2,1,32], index: 18, kind: input, shape index: {}]   ;;  %s5039_s19 = inlined_call_operand.vmem [shape: f32[2,1,32], index: 19, kind: input, shape index: {}]   ;;  %s5040_s20 = inlined_call_operand.vmem [shape: f32[32,256], index: 20, kind: input, shape index: {}]   ;;  %s5041_s23 = inlined_call_operand.<no memory space> [shape: f32[1,1], index: 23, kind: input, shape index: {}]   ;;  %s5042_s21 = inlined_call_operand.vmem [shape: f32[1,256], index: 21, kind: input, shape index: {}]   ;;  %s5043_s22 = inlined_call_operand.vmem [shape: f32[1,256], index: 22, kind: input, shape index: {}]   ;;  %s5044_s24 = inlined_call_operand.vmem [shape: f32[2,128], index: 24, kind: output, shape index: {}]  }
   0x1   :  { %5052 = sst [smem:[#allocation3_spill]] %s5020_s0  ;;  %v4291_v58 = vmov 1966171168   ;;  %v140_v60 = vlaneseq  ;;  %vm579_vm3 = vcmask 64512   ;;  %vm1680_vm4 = vcmask 523264  }
   0x2   :  { %5053 = sst [smem:[#allocation4_spill]] %s5021_s4  ;;  %v138_v59 = vunpack.c.l.s4 %v4291_v58  ;;  %vm3491_vm5 = vcmask 1041409   ;;  %vm3582_vm6 = vcmask 1041408  }
   0x3   :  { %5054 = sst [smem:[#allocation5_spill]] %s5022_s5  ;;  %v4511_v62 = vshrl.u32 %v140_v60, 7 }
   0x4   :  { %5055 = sst [smem:[#allocation6_spill]] %s5023_s6  ;;  %v139_v61 = vunpack.c.0.s8 %v138_v59 }
   0x5   :  { %5056 = sst [smem:[#allocation7_spill]] %s5024_s2 }
   0x6   :  { %5057 = sst [smem:[#allocation8_spill]] %s5025_s3  ;;  %v142_v63 = vsub.s32 %v139_v61, %v4511_v62 }
   0x7   :  { %5058 = sst [smem:[#allocation9_spill]] %s5026_s8 }
   0x8   :  { %5059 = sst [smem:[#allocation10_spill]] %s5027_s7 }
   0x9   :  { %5060 = sst [smem:[#allocation11_spill]] %s5028_s9 }
   0xa   :  { %s5061_s27 = sld [smem:[#allocation3_spill]] }
   0xb   :  { %s5062_s0 = sld [smem:[#allocation4_spill]] }
   0xc   :  { %s5063_s6 = sld [smem:[#allocation5_spill]] }
   0xd   :  { %s5064_s9 = sld [smem:[#allocation6_spill]] }
   0xe   :  { %s5065_s3 = sld [smem:[#allocation7_spill]] }
   0xf   :  { %s5066_s28 = sld [smem:[#allocation8_spill]] }
  0x10   :  { %v79_v0 = vld [vmem:[%s5061_s27] sm:$0xff]  ;;  %v80_v1 = vld [vmem:[%s5061_s27 + $0x8] sm:$0xff]  ;;  %s5069_s29 = sld [smem:[#allocation11_spill]] }
  0x11   :  { %v84_v2 = vsel %vm83_vm0, %v79_v0, 0.0  ;;  %v87_v3 = vsel %vm83_vm0, %v80_v1, 0.0  ;;  %v155_v14 = vld [vmem:[%s5062_s0 + $0x18] sm:$0xff]  ;;  %v154_v16 = vld [vmem:[%s5062_s0 + $0x10] sm:$0xff]  ;;  %v153_v18 = vld [vmem:[%s5062_s0 + $0x8] sm:$0xff] }
  0x12   :  { %85 = vadd.xlane.f32.xlu0 %v84_v2  ;;  %3923 = vmatprep.subr.mxu0 %v155_v14  ;;  %v247_v15 = vld [vmem:[%s5063_s6 + $0x18] sm:$0xff]  ;;  %v246_v17 = vld [vmem:[%s5063_s6 + $0x10] sm:$0xff]  ;;  %v245_v19 = vld [vmem:[%s5063_s6 + $0x8] sm:$0xff]  ;;  %v4518_v2 = vsub.s32 0, %v4511_v62 }
  0x13   :  { %3924 = vmatpush3.msra.mxu0 %v155_v14  ;;  %3934 = vmatprep.subr.mxu1 %v247_v15  ;;  %v152_v20 = vld [vmem:[%s5062_s0] sm:$0xff]  ;;  %v333_v22 = vld [vmem:[%s5064_s9 + $0x18] sm:$0xff]  ;;  %v332_v39 = vld [vmem:[%s5064_s9 + $0x10] sm:$0xff] }
  0x14   :  { %3925 = vmatprep.subr.mxu0 %v154_v16  ;;  %3935 = vmatpush3.msra.mxu1 %v247_v15  ;;  %v244_v21 = vld [vmem:[%s5063_s6] sm:$0xff]  ;;  %v331_v40 = vld [vmem:[%s5064_s9 + $0x8] sm:$0xff] }
  0x15   :  { %3926 = vmatpush3.msra.mxu0 %v154_v16  ;;  %3936 = vmatprep.subr.mxu1 %v246_v17  ;;  %v3606_v30 = vld [vmem:[%s5065_s3] ss:$0 sm:$0xff]  ;;  %s5067_s3 = sld [smem:[#allocation9_spill]] }
  0x16   :  { %88 = vadd.xlane.f32.xlu0 %v87_v3  ;;  %3927 = vmatprep.subr.mxu0 %v153_v18  ;;  %v3607_v32 = vld [vmem:[%s5066_s28] ss:$0 sm:$0xff]  ;;  %s5068_s28 = sld [smem:[#allocation10_spill]] }
  0x17   :  { %3937 = vmatpush3.msra.mxu1 %v246_v17  ;;  %3928 = vmatpush3.msra.mxu0 %v153_v18  ;;  %v330_v41 = vld [vmem:[%s5064_s9] sm:$0xff] }
  0x18   :  { %3938 = vmatprep.subr.mxu1 %v245_v19  ;;  %3929 = vmatprep.subr.mxu0 %v152_v20  ;;  %v3615_v53 = vld [vmem:[%s5069_s29] ss:$0 sm:$0xff] }
  0x19   :  { %3939 = vmatpush3.msra.mxu1 %v245_v19  ;;  %3930 = vmatpush3.msra.mxu0 %v152_v20 }
  0x1a   :  { %3940 = vmatprep.subr.mxu1 %v244_v21  ;;  %3945 = vmatprep.subr.mxu0 %v333_v22 }
  0x1b   :  { %3941 = vmatpush3.msra.mxu1 %v244_v21  ;;  %v3612_v45 = vld [vmem:[%s5067_s3] ss:$0 sm:$0xff] }
  0x1c   :  { %3956 = vmatprep.subr.mxu1 %v4289_v42  ;;  %v3609_v49 = vld [vmem:[%s5068_s28] ss:$0 sm:$0xff] }
  0x9b   :  { %v86_v4 = vpop.xlane.xlu0 %85 }
  0x9c   :  { %v91_v5 = vmul.f32 0.03125, %v86_v4 }
  0x9e   :  { %v93_v6 = vsub.f32 %v79_v0, %v91_v5  ;;  %v3608_v0 = vld.sshfl [vmem:[%s5029_s1] sm:$0x11 pattern:$0x75316420] }
  0x9f   :  { %v89_v7 = vpop.xlane.xlu0 %88  ;;  %v136_v3 = vcombine.high %v3608_v0, %v3608_v0 }
  0xa0   :  { %v92_v8 = vmul.f32 0.03125, %v89_v7  ;;  %v95_v9 = vmul.f32 %v93_v6, %v93_v6 }
  0xa1   :  { %v150_v5 = vrot.slane %v136_v3, %v142_v63  ;;  %v3632_v3 = vld [vmem:[%s5068_s28 + $0x1] ss:$0 sm:$0xff] }
  0xa2   :  { %v94_v10 = vsub.f32 %v80_v1, %v92_v8  ;;  %v97_v11 = vsel %vm83_vm0, %v95_v9, 0.0  ;;  %v143_v1 = vrot.slane %v3608_v0, %v142_v63  ;;  %v3640_v63 = vld [vmem:[%s5067_s3 + $0x1] ss:$0 sm:$0xff] }
  0xa3   :  { %98 = vadd.xlane.f32.xlu1 %v97_v11  ;;  %v4525_v8 = vrot.slane %v150_v5, %v4518_v2 }
  0xa4   :  { %v96_v12 = vmul.f32 %v94_v10, %v94_v10  ;;  %v4521_v4 = vrot.slane %v143_v1, %v4518_v2 }
  0xa6   :  { %v100_v13 = vsel %vm83_vm0, %v96_v12, 0.0 }
  0xa7   :  { %101 = vadd.xlane.f32.xlu1 %v100_v13 }
 0x12c   :  { %v99_v23 = vpop.xlane.xlu1 %98 }
 0x12d   :  { %v103_v24 = vmul.f32 0.03125, %v99_v23 }
 0x12f   :  { %v105_v25 = vadd.f32 1e-12, %v103_v24 }
 0x130   :  { %v102_v26 = vpop.xlane.xlu1 %101 }
 0x131   :  { %4229 = vrsqrt.f32 %v105_v25  ;;  %v104_v27 = vmul.f32 0.03125, %v102_v26  ;;  %v3630_v25 = vld [vmem:[%s5062_s0 + $0x38] sm:$0xff] }
 0x133   :  { %v106_v28 = vadd.f32 1e-12, %v104_v27 }
 0x135   :  { %4231 = vrsqrt.f32 %v106_v28 }
 0x13e   :  { %v4230_v29 = vpop.eup %4229 }
 0x13f   :  { %v109_v31 = vmul.f32 %v4230_v29, %v93_v6 }
 0x141   :  { %v117_v33 = vmul.f32 %v3606_v30, %v109_v31 }
 0x142   :  { %v4232_v34 = vpop.eup %4231 }
 0x143   :  { %v4461_v35 = vadd.f32 %v3607_v32, %v117_v33  ;;  %v110_v36 = vmul.f32 %v4232_v34, %v94_v10  ;;  %v3628_v33 = vld [vmem:[%s5062_s0 + $0x28] sm:$0xff]  ;;  %v3627_v34 = vld [vmem:[%s5062_s0 + $0x20] sm:$0xff] }
 0x145   :  { %v118_v37 = vmul.f32 %v3606_v30, %v110_v36  ;;  %3931 = vmatprep.mubr.msk.f32.mxu0 %vm83_vm0, %v4461_v35  ;;  %3942 = vmatprep.mubr.msk.f32.mxu1 %vm83_vm0, %v4461_v35  ;;  %v3646_v36 = vld [vmem:[%s5064_s9 + $0x38] sm:$0xff] }
 0x147   :  { %v4467_v38 = vadd.f32 %v3607_v32, %v118_v37  ;;  %v3629_v32 = vld [vmem:[%s5062_s0 + $0x30] sm:$0xff] }
 0x148   :  { %v3645_v37 = vld [vmem:[%s5064_s9 + $0x30] sm:$0xff] }
 0x149   :  { %3932 = vmatmul.mubr.msk.f32.vlgmr.msra.gmra.mxu0 %vm83_vm0, %v4467_v38  ;;  %3943 = vmatmul.mubr.msk.f32.vlgmr.msra.gmra.mxu1 %vm83_vm0, %v4467_v38 }
 0x14a   :  { %3946 = vmatpush3.msra.mxu0 %v333_v22  ;;  %3953 = vmatprep.mubr.msk.f32.mxu0 %vm83_vm0, %v4461_v35 }
 0x14b   :  { %3947 = vmatprep.subr.mxu0 %v332_v39  ;;  %3958 = vmatprep.mubr.msk.f32.mxu1 %vm4290_vm1, %v4289_v42 }
 0x14c   :  { %3948 = vmatpush3.msra.mxu0 %v332_v39  ;;  %v3644_v39 = vld [vmem:[%s5064_s9 + $0x28] sm:$0xff] }
 0x14d   :  { %3949 = vmatprep.subr.mxu0 %v331_v40 }
 0x14e   :  { %3950 = vmatpush3.msra.mxu0 %v331_v40  ;;  %v3643_v40 = vld [vmem:[%s5064_s9 + $0x20] sm:$0xff] }
 0x14f   :  { %3951 = vmatprep.subr.mxu0 %v330_v41 }
 0x150   :  { %3952 = vmatpush3.msra.mxu0 %v330_v41  ;;  %v749_v41 = vld [vmem:[%s5030_s10 + $0x8] sm:$0xff] }
 0x151   :  { %3954 = vmatmul.mubr.msk.f32.vlgmr.msra.gmra.mxu0 %vm83_vm0, %v4467_v38  ;;  %3966 = vmatprep.subr.mxu0 %v4289_v42 }
 0x152   :  { %3968 = vmatprep.mubr.msk.f32.mxu0 %vm4290_vm1, %v4289_v42 }
 0x209   :  { %v3933_v43 = vpop.f32.mrf.mxu0  ;;  %v3944_v44 = vpop.f32.mrf.mxu1 }
 0x20a   :  { %v327_v51 = vadd.f32 %v3944_v44, %v3612_v45  ;;  %v241_v54 = vadd.f32 %v3933_v43, %v3609_v49  ;;  %v748_v43 = vld [vmem:[%s5030_s10] sm:$0xff]  ;;  %v3638_v44 = vld [vmem:[%s5063_s6 + $0x38] sm:$0xff] }
 0x20b   :  { %v321_v46 = vpop.f32.mrf.mxu1  ;;  %v235_v47 = vpop.f32.mrf.mxu0 }
 0x20c   :  { %v322_v48 = vadd.f32 %v3612_v45, %v321_v46  ;;  %v236_v50 = vadd.f32 %v3609_v49, %v235_v47 }
 0x20e   :  { %3957 = vmatpush3.xpose.msk.msra.mxu1 %vm426_vm2, %v322_v48  ;;  %v3637_v48 = vld [vmem:[%s5063_s6 + $0x30] sm:$0xff] }
 0x20f   :  { %3961 = vmatprep.subr.mxu1 %v4289_v42 }
 0x211   :  { %v3955_v52 = vpop.f32.mrf.mxu0  ;;  %3959 = vmatmul.mubr.msk.f32.vlgmr.msra.gmra.mxu1 %vm426_vm2, %v236_v50  ;;  %v3636_v50 = vld [vmem:[%s5063_s6 + $0x28] sm:$0xff] }
 0x212   :  { %3962 = vmatpush3.xpose.msk.msra.mxu1 %vm426_vm2, %v327_v51  ;;  %3963 = vmatprep.mubr.msk.f32.mxu1 %vm4290_vm1, %v4289_v42  ;;  %v413_v56 = vadd.f32 %v3955_v52, %v3615_v53  ;;  %v3635_v51 = vld [vmem:[%s5063_s6 + $0x20] sm:$0xff] }
 0x213   :  { %v407_v55 = vpop.f32.mrf.mxu0  ;;  %3971 = vmatprep.subr.mxu1 %v4289_v42 }
 0x214   :  { %v408_v57 = vadd.f32 %v3615_v53, %v407_v55 }
 0x215   :  { %3964 = vmatmul.mubr.msk.f32.vlgmr.msra.gmra.mxu1 %vm426_vm2, %v241_v54  ;;  %v3648_v54 = vld [vmem:[%s5069_s29 + $0x1] ss:$0 sm:$0xff] }
 0x216   :  { %3967 = vmatpush3.msra.mxu0 %v408_v57  ;;  %3972 = vmatpush3.msra.mxu1 %v413_v56 }
 0x217   :  { %3973 = vmatprep.mubr.msk.f32.mxu1 %vm4290_vm1, %v4289_v42  ;;  %3983 = vmatprep.subr.mxu1 %v3630_v25 }
 0x218   :  { %3976 = vmatprep.subr.mxu0 %v749_v41 }
 0x2d1   :  { %v499_v6 = vpop.f32.mrf.mxu1 }
 0x2d2   :  { %v500_v7 = vadd.f32 %v499_v6, %v4521_v4 }
 0x2d3   :  { %v3960_v9 = vpop.f32.mrf.mxu1 }
 0x2d4   :  { %v580_v10 = vsel %vm579_vm3, %v500_v7, -inf }
 0x2d5   :  { %581 = vmax.xlane.f32.xlu0 %v580_v10  ;;  %v575_v11 = vpop.f32.mrf.mxu1 }
 0x2d6   :  { %v576_v12 = vadd.f32 %v575_v11, %v4525_v8 }
 0x2d7   :  { %v3965_v13 = vpop.f32.mrf.mxu1 }
 0x2d8   :  { %v583_v14 = vsel %vm579_vm3, %v576_v12, -inf }
 0x2d9   :  { %584 = vmax.xlane.f32.xlu1 %v583_v14 }
 0x35e   :  { %v582_v15 = vpop.xlane.xlu0 %581 }
 0x35f   :  { %v586_v16 = vsub.f32 %v500_v7, %v582_v15 }
 0x361   :  { %v588_v17 = vmul.f32 1.442695, %v586_v16 }
 0x362   :  { %v585_v18 = vpop.xlane.xlu1 %584 }
 0x363   :  { %4233 = vpow2.f32 %v588_v17  ;;  %v587_v19 = vsub.f32 %v576_v12, %v585_v18 }
 0x365   :  { %v590_v20 = vmul.f32 1.442695, %v587_v19 }
 0x367   :  { %4235 = vpow2.f32 %v590_v20 }
 0x370   :  { %v4234_v21 = vpop.eup %4233 }
 0x371   :  { %v592_v22 = vsel %vm579_vm3, %v4234_v21, 0.0 }
 0x372   :  { %593 = vadd.xlane.f32.xlu0 %v592_v22 }
 0x374   :  { %v4236_v23 = vpop.eup %4235 }
 0x375   :  { %v595_v24 = vsel %vm579_vm3, %v4236_v23, 0.0 }
 0x376   :  { %596 = vadd.xlane.f32.xlu1 %v595_v24 }
 0x3fb   :  { %v594_v26 = vpop.xlane.xlu0 %593 }
 0x3fc   :  { %4237 = vrcp.f32 %v594_v26 }
 0x3ff   :  { %v597_v27 = vpop.xlane.xlu1 %596 }
 0x400   :  { %4239 = vrcp.f32 %v597_v27 }
 0x409   :  { %v4238_v28 = vpop.eup %4237 }
 0x40a   :  { %v600_v29 = vmul.f32 %v4238_v28, %v4234_v21 }
 0x40c   :  { %3969 = vmatmul.mubr.msk.f32.vlgmr.msra.gmra.mxu0 %vm579_vm3, %v600_v29 }
 0x40d   :  { %v4240_v30 = vpop.eup %4239  ;;  %3977 = vmatpush3.msra.mxu0 %v749_v41  ;;  %v3626_v41 = vld [vmem:[%s5031_s11] ss:$0 sm:$0xff] }
 0x40e   :  { %v601_v31 = vmul.f32 %v4240_v30, %v4236_v23  ;;  %3978 = vmatprep.subr.mxu0 %v748_v43 }
 0x40f   :  { %3979 = vmatpush3.msra.mxu0 %v748_v43 }
 0x410   :  { %3974 = vmatmul.mubr.msk.f32.vlgmr.msra.gmra.mxu1 %vm579_vm3, %v601_v31  ;;  %3994 = vmatprep.subr.mxu0 %v3638_v44 }
 0x411   :  { %3984 = vmatpush3.msra.mxu1 %v3630_v25  ;;  %3991 = vmatprep.mubr.msk.f32.mxu1 %vm83_vm0, %v4461_v35 }
 0x412   :  { %3985 = vmatprep.subr.mxu1 %v3629_v32 }
 0x413   :  { %3986 = vmatpush3.msra.mxu1 %v3629_v32 }
 0x414   :  { %3987 = vmatprep.subr.mxu1 %v3628_v33 }
 0x415   :  { %3988 = vmatpush3.msra.mxu1 %v3628_v33  ;;  %v3658_v33 = vld [vmem:[%s5030_s10 + $0x18] sm:$0xff] }
 0x416   :  { %3989 = vmatprep.subr.mxu1 %v3627_v34 }
 0x417   :  { %3990 = vmatpush3.msra.mxu1 %v3627_v34  ;;  %v3657_v34 = vld [vmem:[%s5030_s10 + $0x10] sm:$0xff] }
 0x418   :  { %3992 = vmatmul.mubr.msk.f32.vlgmr.msra.gmra.mxu1 %vm83_vm0, %v4467_v38  ;;  %4005 = vmatprep.subr.mxu1 %v3646_v36 }
 0x419   :  { %4006 = vmatpush3.msra.mxu1 %v3646_v36  ;;  %4013 = vmatprep.mubr.msk.f32.mxu1 %vm83_vm0, %v4461_v35 }
 0x41a   :  { %4007 = vmatprep.subr.mxu1 %v3645_v37 }
 0x41b   :  { %4008 = vmatpush3.msra.mxu1 %v3645_v37 }
 0x41c   :  { %4009 = vmatprep.subr.mxu1 %v3644_v39 }
 0x41d   :  { %4010 = vmatpush3.msra.mxu1 %v3644_v39 }
 0x41e   :  { %4011 = vmatprep.subr.mxu1 %v3643_v40 }
 0x41f   :  { %4012 = vmatpush3.msra.mxu1 %v3643_v40 }
 0x420   :  { %4014 = vmatmul.mubr.msk.f32.vlgmr.msra.gmra.mxu1 %vm83_vm0, %v4467_v38  ;;  %4026 = vmatprep.subr.mxu1 %v4289_v42 }
 0x421   :  { %4028 = vmatprep.mubr.msk.f32.mxu1 %vm4290_vm1, %v4289_v42 }
 0x4cc   :  { %v671_v45 = vpop.f32.mrf.mxu0 }
 0x4cd   :  { %3980 = vmatprep.mubr.msk.f32.mxu0 %vm426_vm2, %v671_v45 }
 0x4ce   :  { %v3970_v46 = vpop.f32.mrf.mxu0 }
 0x4d0   :  { %v744_v47 = vpop.f32.mrf.mxu1 }
 0x4d1   :  { %3981 = vmatmul.mubr.msk.f32.vlgmr.msra.gmra.mxu0 %vm426_vm2, %v744_v47 }
 0x4d2   :  { %3995 = vmatpush3.msra.mxu0 %v3638_v44  ;;  %v3975_v49 = vpop.f32.mrf.mxu1  ;;  %4002 = vmatprep.mubr.msk.f32.mxu0 %vm83_vm0, %v4461_v35 }
 0x4d3   :  { %3996 = vmatprep.subr.mxu0 %v3637_v48 }
 0x4d4   :  { %3997 = vmatpush3.msra.mxu0 %v3637_v48 }
 0x4d5   :  { %3998 = vmatprep.subr.mxu0 %v3636_v50 }
 0x4d6   :  { %3999 = vmatpush3.msra.mxu0 %v3636_v50 }
 0x4d7   :  { %4000 = vmatprep.subr.mxu0 %v3635_v51 }
 0x4d8   :  { %4001 = vmatpush3.msra.mxu0 %v3635_v51  ;;  %v3993_v52 = vpop.f32.mrf.mxu1 }
 0x4d9   :  { %4003 = vmatmul.mubr.msk.f32.vlgmr.msra.gmra.mxu0 %vm83_vm0, %v4467_v38  ;;  %4016 = vmatprep.subr.mxu0 %v4289_v42  ;;  %v924_v7 = vadd.f32 %v3993_v52, %v3632_v3 }
 0x4da   :  { %4018 = vmatprep.mubr.msk.f32.mxu0 %vm4290_vm1, %v4289_v42  ;;  %v918_v53 = vpop.f32.mrf.mxu1 }
 0x4db   :  { %v919_v5 = vadd.f32 %v3632_v3, %v918_v53 }
 0x4e0   :  { %v4015_v55 = vpop.f32.mrf.mxu1 }
 0x4e1   :  { %v1100_v56 = vadd.f32 %v4015_v55, %v3648_v54 }
 0x4e2   :  { %v1094_v57 = vpop.f32.mrf.mxu1 }
 0x4e3   :  { %v1095_v58 = vadd.f32 %v3648_v54, %v1094_v57 }
 0x4e5   :  { %4027 = vmatpush3.msra.mxu1 %v1095_v58 }
 0x4e6   :  { %4036 = vmatprep.subr.mxu1 %v3658_v33 }
 0x591   :  { %v4599_v59 = vpop.f32.mrf.mxu0 }
 0x592   :  { %v838_v43 = vadd.f32 %v4599_v59, %v3626_v41 }
 0x593   :  { %v4601_v60 = vpop.f32.mrf.mxu0 }
 0x594   :  { %v837_v45 = vadd.f32 %v3626_v41, %v4601_v60 }
 0x599   :  { %v4004_v61 = vpop.f32.mrf.mxu0 }
 0x59a   :  { %v1012_v6 = vadd.f32 %v4004_v61, %v3640_v63 }
 0x59b   :  { %v1006_v0 = vpop.f32.mrf.mxu0 }
 0x59c   :  { %v1007_v1 = vadd.f32 %v3640_v63, %v1006_v0  ;;  %v1557_v63 = vld [vmem:[%s5032_s14 + $0x10] sm:$0xff]  ;;  %v1556_v0 = vld [vmem:[%s5032_s14 + $0x8] sm:$0xff] }
 0x59e   :  { %4017 = vmatpush3.xpose.msk.msra.mxu0 %vm426_vm2, %v1007_v1  ;;  %v1555_v1 = vld [vmem:[%s5032_s14] sm:$0xff] }
 0x59f   :  { %4021 = vmatprep.subr.mxu0 %v4289_v42 }
 0x5a1   :  { %4019 = vmatmul.mubr.msk.f32.vlgmr.msra.gmra.mxu0 %vm426_vm2, %v919_v5 }
 0x5a2   :  { %4022 = vmatpush3.xpose.msk.msra.mxu0 %vm426_vm2, %v1012_v6  ;;  %4023 = vmatprep.mubr.msk.f32.mxu0 %vm4290_vm1, %v4289_v42 }
 0x5a3   :  { %4031 = vmatprep.subr.mxu0 %v4289_v42 }
 0x5a5   :  { %4024 = vmatmul.mubr.msk.f32.vlgmr.msra.gmra.mxu0 %vm426_vm2, %v924_v7 }
 0x5a6   :  { %4032 = vmatpush3.msra.mxu0 %v1100_v56  ;;  %4033 = vmatprep.mubr.msk.f32.mxu0 %vm4290_vm1, %v4289_v42 }
 0x661   :  { %v1175_v9 = vpop.f32.mrf.mxu0 }
 0x662   :  { %v1176_v10 = vadd.f32 %v1175_v9, %v4521_v4 }
 0x663   :  { %v4020_v11 = vpop.f32.mrf.mxu0 }
 0x664   :  { %v1255_v12 = vsel %vm579_vm3, %v1176_v10, -inf }
 0x665   :  { %1256 = vmax.xlane.f32.xlu0 %v1255_v12  ;;  %v1251_v13 = vpop.f32.mrf.mxu0  ;;  %v3661_v12 = vld [vmem:[%s5033_s12] ss:$0 sm:$0xff] }
 0x666   :  { %v1252_v14 = vadd.f32 %v1251_v13, %v4525_v8 }
 0x667   :  { %v4025_v15 = vpop.f32.mrf.mxu0 }
 0x668   :  { %v1258_v16 = vsel %vm579_vm3, %v1252_v14, -inf }
 0x669   :  { %1259 = vmax.xlane.f32.xlu1 %v1258_v16 }
 0x6ee   :  { %v1257_v17 = vpop.xlane.xlu0 %1256 }
 0x6ef   :  { %v1261_v18 = vsub.f32 %v1176_v10, %v1257_v17  ;;  %v3662_v17 = vld [vmem:[%s5034_s13] ss:$0 sm:$0xff] }
 0x6f1   :  { %v1263_v19 = vmul.f32 1.442695, %v1261_v18 }
 0x6f2   :  { %v1260_v20 = vpop.xlane.xlu1 %1259 }
 0x6f3   :  { %4241 = vpow2.f32 %v1263_v19  ;;  %v1262_v21 = vsub.f32 %v1252_v14, %v1260_v20 }
 0x6f5   :  { %v1265_v22 = vmul.f32 1.442695, %v1262_v21  ;;  %v1672_v21 = vld [vmem:[%s5035_s16 + $0x38] sm:$0xff] }
 0x6f7   :  { %4243 = vpow2.f32 %v1265_v22  ;;  %v1671_v22 = vld [vmem:[%s5035_s16 + $0x30] sm:$0xff] }
 0x700   :  { %v4242_v23 = vpop.eup %4241 }
 0x701   :  { %v1267_v24 = vsel %vm579_vm3, %v4242_v23, 0.0 }
 0x702   :  { %1268 = vadd.xlane.f32.xlu0 %v1267_v24  ;;  %v1669_v24 = vld [vmem:[%s5035_s16 + $0x20] sm:$0xff] }
 0x704   :  { %v4244_v25 = vpop.eup %4243 }
 0x705   :  { %v1270_v26 = vsel %vm579_vm3, %v4244_v25, 0.0 }
 0x706   :  { %1271 = vadd.xlane.f32.xlu1 %v1270_v26  ;;  %v1667_v26 = vld [vmem:[%s5035_s16 + $0x10] sm:$0xff] }
 0x78b   :  { %v1269_v27 = vpop.xlane.xlu0 %1268 }
 0x78c   :  { %4245 = vrcp.f32 %v1269_v27  ;;  %v1666_v27 = vld [vmem:[%s5035_s16 + $0x8] sm:$0xff] }
 0x78f   :  { %v1272_v28 = vpop.xlane.xlu1 %1271 }
 0x790   :  { %4247 = vrcp.f32 %v1272_v28  ;;  %v1665_v28 = vld [vmem:[%s5035_s16] sm:$0xff] }
 0x799   :  { %v4246_v29 = vpop.eup %4245 }
 0x79a   :  { %v1275_v30 = vmul.f32 %v4246_v29, %v4242_v23  ;;  %v1670_v23 = vld [vmem:[%s5035_s16 + $0x28] sm:$0xff]  ;;  %v3663_v29 = vld [vmem:[%s5036_s15] ss:$0 sm:$0xff] }
 0x79c   :  { %4029 = vmatmul.mubr.msk.f32.vlgmr.msra.gmra.mxu1 %vm579_vm3, %v1275_v30 }
 0x79d   :  { %v4248_v31 = vpop.eup %4247  ;;  %4037 = vmatpush3.msra.mxu1 %v3658_v33 }
 0x79e   :  { %v1276_v32 = vmul.f32 %v4248_v31, %v4244_v25  ;;  %4038 = vmatprep.subr.mxu1 %v3657_v34  ;;  %v1668_v25 = vld [vmem:[%s5035_s16 + $0x18] sm:$0xff] }
 0x79f   :  { %4039 = vmatpush3.msra.mxu1 %v3657_v34 }
 0x7a0   :  { %4034 = vmatmul.mubr.msk.f32.vlgmr.msra.gmra.mxu0 %vm579_vm3, %v1276_v32  ;;  %4054 = vmatprep.subr.mxu1 %v1672_v21 }
 0x85c   :  { %v1346_v36 = vpop.f32.mrf.mxu1 }
 0x85d   :  { %4040 = vmatprep.mubr.msk.f32.mxu1 %vm426_vm2, %v1346_v36 }
 0x85e   :  { %v4030_v37 = vpop.f32.mrf.mxu1 }
 0x860   :  { %v1419_v39 = vpop.f32.mrf.mxu0 }
 0x861   :  { %4041 = vmatmul.mubr.msk.f32.vlgmr.msra.gmra.mxu1 %vm426_vm2, %v1419_v39 }
 0x862   :  { %v4035_v40 = vpop.f32.mrf.mxu0  ;;  %4055 = vmatpush3.msra.mxu1 %v1672_v21 }
 0x863   :  { %4056 = vmatprep.subr.mxu1 %v1671_v22 }
 0x864   :  { %4057 = vmatpush3.msra.mxu1 %v1671_v22 }
 0x865   :  { %4058 = vmatprep.subr.mxu1 %v1670_v23 }
 0x866   :  { %4059 = vmatpush3.msra.mxu1 %v1670_v23 }
 0x867   :  { %4060 = vmatprep.subr.mxu1 %v1669_v24 }
 0x868   :  { %4061 = vmatpush3.msra.mxu1 %v1669_v24 }
 0x869   :  { %4062 = vmatprep.subr.mxu1 %v1668_v25 }
 0x86a   :  { %4063 = vmatpush3.msra.mxu1 %v1668_v25 }
 0x86b   :  { %4064 = vmatprep.subr.mxu1 %v1667_v26 }
 0x86c   :  { %4065 = vmatpush3.msra.mxu1 %v1667_v26 }
 0x86d   :  { %4066 = vmatprep.subr.mxu1 %v1666_v27 }
 0x86e   :  { %4067 = vmatpush3.msra.mxu1 %v1666_v27 }
 0x86f   :  { %4068 = vmatprep.subr.mxu1 %v1665_v28 }
 0x870   :  { %4069 = vmatpush3.msra.mxu1 %v1665_v28  ;;  %v3669_v28 = vld [vmem:[%s5038_s18] ss:$0 sm:$0xff] }
 0x921   :  { %v4042_v44 = vpop.f32.mrf.mxu1 }
 0x922   :  { %v1508_v46 = vadd.f32 %v4042_v44, %v838_v43 }
 0x923   :  { %v1498_v47 = vpop.f32.mrf.mxu1 }
 0x924   :  { %v1507_v48 = vadd.f32 %v1498_v47, %v837_v45  ;;  %v1510_v49 = vadd.f32 %v1508_v46, %v4467_v38 }
 0x926   :  { %v1516_v50 = vsel %vm83_vm0, %v1510_v49, 0.0  ;;  %v1509_v51 = vadd.f32 %v1507_v48, %v4461_v35  ;;  %v1558_v35 = vld [vmem:[%s5032_s14 + $0x18] sm:$0xff] }
 0x927   :  { %1517 = vadd.xlane.f32.xlu1 %v1516_v50  ;;  %4043 = vmatprep.subr.mxu0 %v1558_v35 }
 0x928   :  { %v1513_v52 = vsel %vm83_vm0, %v1509_v51, 0.0  ;;  %4044 = vmatpush3.msra.mxu0 %v1558_v35 }
 0x929   :  { %1514 = vadd.xlane.f32.xlu0 %v1513_v52  ;;  %4045 = vmatprep.subr.mxu0 %v1557_v63 }
 0x92a   :  { %4046 = vmatpush3.msra.mxu0 %v1557_v63 }
 0x92b   :  { %4047 = vmatprep.subr.mxu0 %v1556_v0 }
 0x92c   :  { %4048 = vmatpush3.msra.mxu0 %v1556_v0 }
 0x92d   :  { %4049 = vmatprep.subr.mxu0 %v1555_v1 }
 0x92e   :  { %4050 = vmatpush3.msra.mxu0 %v1555_v1 }
 0x9b0   :  { %v1518_v53 = vpop.xlane.xlu1 %1517 }
 0x9b1   :  { %v1520_v54 = vmul.f32 0.03125, %v1518_v53 }
 0x9b2   :  { %v1515_v55 = vpop.xlane.xlu0 %1514 }
 0x9b3   :  { %v1522_v56 = vsub.f32 %v1510_v49, %v1520_v54  ;;  %v1519_v57 = vmul.f32 0.03125, %v1515_v55  ;;  %v3666_v55 = vld [vmem:[%s5037_s17] ss:$0 sm:$0xff] }
 0x9b5   :  { %v1521_v58 = vsub.f32 %v1509_v51, %v1519_v57  ;;  %v1524_v59 = vmul.f32 %v1522_v56, %v1522_v56 }
 0x9b7   :  { %v1528_v60 = vsel %vm83_vm0, %v1524_v59, 0.0  ;;  %v1523_v61 = vmul.f32 %v1521_v58, %v1521_v58 }
 0x9b8   :  { %1529 = vadd.xlane.f32.xlu1 %v1528_v60 }
 0x9b9   :  { %v1525_v38 = vsel %vm83_vm0, %v1523_v61, 0.0 }
 0x9ba   :  { %1526 = vadd.xlane.f32.xlu0 %v1525_v38 }
 0xa41   :  { %v1530_v3 = vpop.xlane.xlu1 %1529 }
 0xa42   :  { %v1532_v5 = vmul.f32 0.03125, %v1530_v3 }
 0xa43   :  { %v1527_v6 = vpop.xlane.xlu0 %1526 }
 0xa44   :  { %v1534_v7 = vadd.f32 1e-12, %v1532_v5  ;;  %v1531_v9 = vmul.f32 0.03125, %v1527_v6 }
 0xa46   :  { %4249 = vrsqrt.f32 %v1534_v7  ;;  %v1533_v10 = vadd.f32 1e-12, %v1531_v9 }
 0xa48   :  { %4251 = vrsqrt.f32 %v1533_v10 }
 0xa53   :  { %v4250_v11 = vpop.eup %4249 }
 0xa54   :  { %v1538_v13 = vmul.f32 %v4250_v11, %v1522_v56 }
 0xa55   :  { %v4252_v14 = vpop.eup %4251 }
 0xa56   :  { %v1537_v15 = vmul.f32 %v4252_v14, %v1521_v58  ;;  %v1546_v16 = vmul.f32 %v3661_v12, %v1538_v13  ;;  %v3691_v13 = vld [vmem:[%s5064_s9 + $0x58] sm:$0xff]  ;;  %v3674_v14 = vld [vmem:[%s5062_s0 + $0x50] sm:$0xff] }
 0xa57   :  { %4095 = vmatprep.subr.mxu1 %v3691_v13 }
 0xa58   :  { %v1545_v18 = vmul.f32 %v3661_v12, %v1537_v15  ;;  %v4666_v20 = vadd.f32 %v3662_v17, %v1546_v16  ;;  %v3675_v12 = vld [vmem:[%s5062_s0 + $0x58] sm:$0xff]  ;;  %v3690_v15 = vld [vmem:[%s5064_s9 + $0x50] sm:$0xff]  ;;  %v3673_v16 = vld [vmem:[%s5062_s0 + $0x48] sm:$0xff] }
 0xa59   :  { %4073 = vmatprep.subr.mxu0 %v3675_v12 }
 0xa5a   :  { %v4664_v19 = vadd.f32 %v3662_v17, %v1545_v18  ;;  %v3689_v17 = vld [vmem:[%s5064_s9 + $0x48] sm:$0xff]  ;;  %v3672_v18 = vld [vmem:[%s5062_s0 + $0x40] sm:$0xff] }
 0xa5c   :  { %4051 = vmatprep.mubr.msk.f32.mxu0 %vm83_vm0, %v4664_v19 }
 0xa5d   :  { %4052 = vmatmul.mubr.msk.f32.vlgmr.msra.gmra.mxu0 %vm83_vm0, %v4666_v20 }
 0xa5e   :  { %4074 = vmatpush3.msra.mxu0 %v3675_v12 }
 0xa5f   :  { %4075 = vmatprep.subr.mxu0 %v3674_v14 }
 0xa60   :  { %4076 = vmatpush3.msra.mxu0 %v3674_v14  ;;  %v3710_v14 = vld [vmem:[%s5062_s0 + $0x78] sm:$0xff] }
 0xa61   :  { %4077 = vmatprep.subr.mxu0 %v3673_v16 }
 0xa62   :  { %4078 = vmatpush3.msra.mxu0 %v3673_v16 }
 0xa63   :  { %4079 = vmatprep.subr.mxu0 %v3672_v18 }
 0xa64   :  { %4080 = vmatpush3.msra.mxu0 %v3672_v18 }
 0xb1d   :  { %v4053_v30 = vpop.f32.mrf.mxu0 }
 0xb1e   :  { %v1644_v31 = vadd.f32 %v4053_v30, %v3663_v29 }
 0xb1f   :  { %v1638_v32 = vpop.f32.mrf.mxu0 }
 0xb20   :  { %v1650_v33 = vmul.f32 0.044715, %v1644_v31  ;;  %v1639_v34 = vadd.f32 %v3663_v29, %v1638_v32  ;;  %v1648_v52 = vmul.f32 0.5, %v1644_v31 }
 0xb22   :  { %v1652_v36 = vmul.f32 %v1650_v33, %v1644_v31  ;;  %v1649_v37 = vmul.f32 0.044715, %v1639_v34  ;;  %v1647_v50 = vmul.f32 0.5, %v1639_v34  ;;  %v3670_v33 = vld [vmem:[%s5039_s19] ss:$0 sm:$0xff] }
 0xb24   :  { %v1654_v39 = vmul.f32 %v1652_v36, %v1644_v31  ;;  %v1651_v40 = vmul.f32 %v1649_v37, %v1639_v34 }
 0xb26   :  { %v1656_v41 = vadd.f32 %v1654_v39, %v1644_v31  ;;  %v1653_v43 = vmul.f32 %v1651_v40, %v1639_v34  ;;  %v3682_v39 = vld [vmem:[%s5063_s6 + $0x50] sm:$0xff]  ;;  %v3681_v40 = vld [vmem:[%s5063_s6 + $0x48] sm:$0xff] }
 0xb28   :  { %v1658_v44 = vmul.f32 0.7978846, %v1656_v41  ;;  %v1655_v45 = vadd.f32 %v1653_v43, %v1639_v34  ;;  %v3680_v41 = vld [vmem:[%s5063_s6 + $0x40] sm:$0xff] }
 0xb2a   :  { %4253 = vtanh.f32 %v1658_v44  ;;  %v1657_v46 = vmul.f32 0.7978846, %v1655_v45  ;;  %v3685_v45 = vld [vmem:[%s5067_s3 + $0x2] ss:$0 sm:$0xff] }
 0xb2c   :  { %4255 = vtanh.f32 %v1657_v46 }
 0xb37   :  { %v4254_v47 = vpop.eup %4253 }
 0xb38   :  { %v1662_v49 = vadd.f32 1.0, %v4254_v47 }
 0xb39   :  { %v4256_v48 = vpop.eup %4255 }
 0xb3a   :  { %v1661_v51 = vadd.f32 1.0, %v4256_v48  ;;  %v1664_v54 = vmul.f32 %v1662_v49, %v1648_v52  ;;  %v3677_v48 = vld [vmem:[%s5068_s28 + $0x2] ss:$0 sm:$0xff] }
 0xb3c   :  { %v1663_v53 = vmul.f32 %v1661_v51, %v1647_v50  ;;  %v3693_v50 = vld [vmem:[%s5069_s29 + $0x2] ss:$0 sm:$0xff] }
 0xb3e   :  { %4070 = vmatprep.mubr.msk.f32.mxu1 %vm1680_vm4, %v1663_v53 }
 0xb3f   :  { %4071 = vmatmul.mubr.msk.f32.vlgmr.msra.gmra.mxu1 %vm1680_vm4, %v1664_v54 }
 0xb40   :  { %4096 = vmatpush3.msra.mxu1 %v3691_v13 }
 0xb41   :  { %4097 = vmatprep.subr.mxu1 %v3690_v15 }
 0xb42   :  { %4098 = vmatpush3.msra.mxu1 %v3690_v15  ;;  %v3703_v15 = vld [vmem:[%s5030_s10 + $0x28] sm:$0xff] }
 0xb43   :  { %4099 = vmatprep.subr.mxu1 %v3689_v17 }
 0xb44   :  { %4100 = vmatpush3.msra.mxu1 %v3689_v17 }
 0xbff   :  { %v4072_v56 = vpop.f32.mrf.mxu1 }
 0xc00   :  { %v1759_v57 = vadd.f32 %v4072_v56, %v3666_v55 }
 0xc01   :  { %v1753_v58 = vpop.f32.mrf.mxu1 }
 0xc02   :  { %v1754_v59 = vadd.f32 %v3666_v55, %v1753_v58  ;;  %v1763_v60 = vadd.f32 %v1759_v57, %v4666_v20  ;;  %v3683_v20 = vld [vmem:[%s5063_s6 + $0x58] sm:$0xff] }
 0xc03   :  { %4084 = vmatprep.subr.mxu0 %v3683_v20 }
 0xc04   :  { %v1769_v61 = vsel %vm83_vm0, %v1763_v60, 0.0  ;;  %v1762_v38 = vadd.f32 %v1754_v59, %v4664_v19  ;;  %v3688_v19 = vld [vmem:[%s5064_s9 + $0x40] sm:$0xff] }
 0xc05   :  { %1770 = vadd.xlane.f32.xlu1 %v1769_v61  ;;  %4101 = vmatprep.subr.mxu1 %v3688_v19 }
 0xc06   :  { %v1766_v35 = vsel %vm83_vm0, %v1762_v38, 0.0  ;;  %4102 = vmatpush3.msra.mxu1 %v3688_v19 }
 0xc07   :  { %1767 = vadd.xlane.f32.xlu0 %v1766_v35  ;;  %4111 = vmatprep.subr.mxu1 %v4289_v42 }
 0xc8e   :  { %v1771_v63 = vpop.xlane.xlu1 %1770 }
 0xc8f   :  { %v1773_v0 = vmul.f32 0.03125, %v1771_v63 }
 0xc90   :  { %v1768_v1 = vpop.xlane.xlu0 %1767 }
 0xc91   :  { %v1775_v3 = vsub.f32 %v1763_v60, %v1773_v0  ;;  %v1772_v5 = vmul.f32 0.03125, %v1768_v1 }
 0xc93   :  { %v1774_v6 = vsub.f32 %v1762_v38, %v1772_v5  ;;  %v1777_v7 = vmul.f32 %v1775_v3, %v1775_v3 }
 0xc95   :  { %v1781_v9 = vsel %vm83_vm0, %v1777_v7, 0.0  ;;  %v1776_v10 = vmul.f32 %v1774_v6, %v1774_v6 }
 0xc96   :  { %1782 = vadd.xlane.f32.xlu1 %v1781_v9 }
 0xc97   :  { %v1778_v11 = vsel %vm83_vm0, %v1776_v10, 0.0 }
 0xc98   :  { %1779 = vadd.xlane.f32.xlu0 %v1778_v11 }
 0xd1f   :  { %v1783_v21 = vpop.xlane.xlu1 %1782 }
 0xd20   :  { %v1785_v22 = vmul.f32 0.03125, %v1783_v21  ;;  %v3709_v21 = vld [vmem:[%s5062_s0 + $0x70] sm:$0xff] }
 0xd21   :  { %v1780_v23 = vpop.xlane.xlu0 %1779 }
 0xd22   :  { %v1787_v24 = vadd.f32 1e-12, %v1785_v22  ;;  %v1784_v25 = vmul.f32 0.03125, %v1780_v23  ;;  %v3708_v23 = vld [vmem:[%s5062_s0 + $0x68] sm:$0xff] }
 0xd24   :  { %4257 = vrsqrt.f32 %v1787_v24  ;;  %v1786_v26 = vadd.f32 1e-12, %v1784_v25  ;;  %v3707_v24 = vld [vmem:[%s5062_s0 + $0x60] sm:$0xff]  ;;  %v3726_v25 = vld [vmem:[%s5064_s9 + $0x78] sm:$0xff] }
 0xd26   :  { %4259 = vrsqrt.f32 %v1786_v26  ;;  %v3725_v26 = vld [vmem:[%s5064_s9 + $0x70] sm:$0xff] }
 0xd31   :  { %v4258_v27 = vpop.eup %4257 }
 0xd32   :  { %v1791_v29 = vmul.f32 %v4258_v27, %v1775_v3  ;;  %v3724_v27 = vld [vmem:[%s5064_s9 + $0x68] sm:$0xff] }
 0xd33   :  { %v4260_v30 = vpop.eup %4259 }
 0xd34   :  { %v1790_v31 = vmul.f32 %v4260_v30, %v1774_v6  ;;  %v1799_v32 = vmul.f32 %v3669_v28, %v1791_v29  ;;  %v3702_v29 = vld [vmem:[%s5030_s10 + $0x20] sm:$0xff]  ;;  %v3718_v30 = vld [vmem:[%s5063_s6 + $0x78] sm:$0xff] }
 0xd36   :  { %v1798_v34 = vmul.f32 %v3669_v28, %v1790_v31  ;;  %v4746_v37 = vadd.f32 %v3670_v33, %v1799_v32  ;;  %v3723_v28 = vld [vmem:[%s5064_s9 + $0x60] sm:$0xff] }
 0xd38   :  { %v4744_v36 = vadd.f32 %v3670_v33, %v1798_v34  ;;  %v3717_v34 = vld [vmem:[%s5063_s6 + $0x70] sm:$0xff] }
 0xd3a   :  { %4081 = vmatprep.mubr.msk.f32.mxu0 %vm83_vm0, %v4744_v36  ;;  %4103 = vmatprep.mubr.msk.f32.mxu1 %vm83_vm0, %v4744_v36 }
 0xd3b   :  { %4082 = vmatmul.mubr.msk.f32.vlgmr.msra.gmra.mxu0 %vm83_vm0, %v4746_v37  ;;  %4104 = vmatmul.mubr.msk.f32.vlgmr.msra.gmra.mxu1 %vm83_vm0, %v4746_v37 }
 0xd3c   :  { %4085 = vmatpush3.msra.mxu0 %v3683_v20  ;;  %4092 = vmatprep.mubr.msk.f32.mxu0 %vm83_vm0, %v4744_v36 }
 0xd3d   :  { %4086 = vmatprep.subr.mxu0 %v3682_v39  ;;  %4113 = vmatprep.mubr.msk.f32.mxu1 %vm4290_vm1, %v4289_v42 }
 0xd3e   :  { %4087 = vmatpush3.msra.mxu0 %v3682_v39 }
 0xd3f   :  { %4088 = vmatprep.subr.mxu0 %v3681_v40 }
 0xd40   :  { %4089 = vmatpush3.msra.mxu0 %v3681_v40  ;;  %v3716_v40 = vld [vmem:[%s5063_s6 + $0x68] sm:$0xff] }
 0xd41   :  { %4090 = vmatprep.subr.mxu0 %v3680_v41 }
 0xd42   :  { %4091 = vmatpush3.msra.mxu0 %v3680_v41  ;;  %v3715_v41 = vld [vmem:[%s5063_s6 + $0x60] sm:$0xff] }
 0xd43   :  { %4093 = vmatmul.mubr.msk.f32.vlgmr.msra.gmra.mxu0 %vm83_vm0, %v4746_v37  ;;  %4106 = vmatprep.subr.mxu0 %v4289_v42 }
 0xd44   :  { %4108 = vmatprep.mubr.msk.f32.mxu0 %vm4290_vm1, %v4289_v42 }
 0xdfb   :  { %v4083_v43 = vpop.f32.mrf.mxu0  ;;  %v4105_v46 = vpop.f32.mrf.mxu1 }
 0xdfc   :  { %v1901_v53 = vadd.f32 %v4083_v43, %v3677_v48  ;;  %v2077_v55 = vadd.f32 %v4105_v46, %v3693_v50 }
 0xdfd   :  { %v1895_v44 = vpop.f32.mrf.mxu0  ;;  %v2071_v54 = vpop.f32.mrf.mxu1 }
 0xdfe   :  { %v1896_v56 = vadd.f32 %v3677_v48, %v1895_v44  ;;  %v2072_v57 = vadd.f32 %v3693_v50, %v2071_v54 }
 0xe03   :  { %v4094_v47 = vpop.f32.mrf.mxu0 }
 0xe04   :  { %v1989_v49 = vadd.f32 %v4094_v47, %v3685_v45 }
 0xe05   :  { %v1983_v51 = vpop.f32.mrf.mxu0 }
 0xe06   :  { %v1984_v52 = vadd.f32 %v3685_v45, %v1983_v51  ;;  %4112 = vmatpush3.xpose.msk.msra.mxu1 %vm426_vm2, %v1989_v49  ;;  %v3728_v45 = vld [vmem:[%s5069_s29 + $0x3] ss:$0 sm:$0xff] }
 0xe07   :  { %4121 = vmatprep.subr.mxu1 %v4289_v42 }
 0xe08   :  { %4107 = vmatpush3.xpose.msk.msra.mxu0 %vm426_vm2, %v1984_v52 }
 0xe09   :  { %4114 = vmatmul.mubr.msk.f32.vlgmr.msra.gmra.mxu1 %vm426_vm2, %v1901_v53  ;;  %4116 = vmatprep.subr.mxu0 %v4289_v42  ;;  %v3720_v53 = vld [vmem:[%s5067_s3 + $0x3] ss:$0 sm:$0xff] }
 0xe0a   :  { %4122 = vmatpush3.msra.mxu1 %v2077_v55  ;;  %4123 = vmatprep.mubr.msk.f32.mxu1 %vm4290_vm1, %v4289_v42 }
 0xe0b   :  { %4109 = vmatmul.mubr.msk.f32.vlgmr.msra.gmra.mxu0 %vm426_vm2, %v1896_v56  ;;  %4133 = vmatprep.subr.mxu1 %v3710_v14  ;;  %v3712_v56 = vld [vmem:[%s5068_s28 + $0x3] ss:$0 sm:$0xff] }
 0xe0c   :  { %4117 = vmatpush3.msra.mxu0 %v2072_v57  ;;  %4118 = vmatprep.mubr.msk.f32.mxu0 %vm4290_vm1, %v4289_v42 }
 0xe0d   :  { %4126 = vmatprep.subr.mxu0 %v3703_v15 }
 0xec9   :  { %v2228_v58 = vpop.f32.mrf.mxu1 }
 0xeca   :  { %v2229_v59 = vadd.f32 %v2228_v58, %v4525_v8 }
 0xecb   :  { %v2152_v60 = vpop.f32.mrf.mxu0  ;;  %v4115_v61 = vpop.f32.mrf.mxu1 }
 0xecc   :  { %v2153_v38 = vadd.f32 %v2152_v60, %v4521_v4  ;;  %v2235_v35 = vsel %vm579_vm3, %v2229_v59, -inf }
 0xecd   :  { %2236 = vmax.xlane.f32.xlu1 %v2235_v35  ;;  %v4110_v63 = vpop.f32.mrf.mxu0 }
 0xece   :  { %v2232_v0 = vsel %vm579_vm3, %v2153_v38, -inf }
 0xecf   :  { %2233 = vmax.xlane.f32.xlu0 %v2232_v0 }
 0xf56   :  { %v2237_v1 = vpop.xlane.xlu1 %2236 }
 0xf57   :  { %v2239_v3 = vsub.f32 %v2229_v59, %v2237_v1 }
 0xf58   :  { %v2234_v5 = vpop.xlane.xlu0 %2233 }
 0xf59   :  { %v2242_v6 = vmul.f32 1.442695, %v2239_v3  ;;  %v2238_v7 = vsub.f32 %v2153_v38, %v2234_v5 }
 0xf5b   :  { %4261 = vpow2.f32 %v2242_v6  ;;  %v2240_v9 = vmul.f32 1.442695, %v2238_v7 }
 0xf5d   :  { %4263 = vpow2.f32 %v2240_v9 }
 0xf68   :  { %v4262_v10 = vpop.eup %4261 }
 0xf69   :  { %v2247_v11 = vsel %vm579_vm3, %v4262_v10, 0.0 }
 0xf6a   :  { %v4264_v12 = vpop.eup %4263  ;;  %2248 = vadd.xlane.f32.xlu1 %v2247_v11 }
 0xf6b   :  { %v2244_v13 = vsel %vm579_vm3, %v4264_v12, 0.0 }
 0xf6c   :  { %2245 = vadd.xlane.f32.xlu0 %v2244_v13 }
 0xff3   :  { %v2249_v16 = vpop.xlane.xlu1 %2248 }
 0xff4   :  { %4265 = vrcp.f32 %v2249_v16 }
 0xff5   :  { %v2246_v17 = vpop.xlane.xlu0 %2245 }
 0xff6   :  { %4267 = vrcp.f32 %v2246_v17 }
0x1001   :  { %v4266_v18 = vpop.eup %4265 }
0x1002   :  { %v2253_v19 = vmul.f32 %v4266_v18, %v4262_v10 }
0x1003   :  { %v4268_v20 = vpop.eup %4267 }
0x1004   :  { %4124 = vmatmul.mubr.msk.f32.vlgmr.msra.gmra.mxu1 %vm579_vm3, %v2253_v19  ;;  %v2252_v22 = vmul.f32 %v4268_v20, %v4264_v12  ;;  %v3738_v20 = vld [vmem:[%s5030_s10 + $0x38] sm:$0xff] }
0x1005   :  { %4134 = vmatpush3.msra.mxu1 %v3710_v14  ;;  %4141 = vmatprep.mubr.msk.f32.mxu1 %vm83_vm0, %v4744_v36 }
0x1006   :  { %4135 = vmatprep.subr.mxu1 %v3709_v21  ;;  %4119 = vmatmul.mubr.msk.f32.vlgmr.msra.gmra.mxu0 %vm579_vm3, %v2252_v22 }
0x1007   :  { %4136 = vmatpush3.msra.mxu1 %v3709_v21  ;;  %4127 = vmatpush3.msra.mxu0 %v3703_v15  ;;  %v3737_v21 = vld [vmem:[%s5030_s10 + $0x30] sm:$0xff] }
0x1008   :  { %4137 = vmatprep.subr.mxu1 %v3708_v23  ;;  %4128 = vmatprep.subr.mxu0 %v3702_v29 }
0x1009   :  { %4138 = vmatpush3.msra.mxu1 %v3708_v23  ;;  %4129 = vmatpush3.msra.mxu0 %v3702_v29 }
0x100a   :  { %4139 = vmatprep.subr.mxu1 %v3707_v24  ;;  %4144 = vmatprep.subr.mxu0 %v3718_v30 }
0x100b   :  { %4140 = vmatpush3.msra.mxu1 %v3707_v24 }
0x100c   :  { %4142 = vmatmul.mubr.msk.f32.vlgmr.msra.gmra.mxu1 %vm83_vm0, %v4746_v37  ;;  %4155 = vmatprep.subr.mxu1 %v3726_v25 }
0x100d   :  { %4156 = vmatpush3.msra.mxu1 %v3726_v25  ;;  %4163 = vmatprep.mubr.msk.f32.mxu1 %vm83_vm0, %v4744_v36 }
0x100e   :  { %4157 = vmatprep.subr.mxu1 %v3725_v26 }
0x100f   :  { %4158 = vmatpush3.msra.mxu1 %v3725_v26  ;;  %v3706_v26 = vld [vmem:[%s5031_s11 + $0x1] ss:$0 sm:$0xff] }
0x1010   :  { %4159 = vmatprep.subr.mxu1 %v3724_v27 }
0x1011   :  { %4160 = vmatpush3.msra.mxu1 %v3724_v27 }
0x1012   :  { %4161 = vmatprep.subr.mxu1 %v3723_v28 }
0x1013   :  { %4162 = vmatpush3.msra.mxu1 %v3723_v28 }
0x1014   :  { %4164 = vmatmul.mubr.msk.f32.vlgmr.msra.gmra.mxu1 %vm83_vm0, %v4746_v37  ;;  %4176 = vmatprep.subr.mxu1 %v4289_v42 }
0x1015   :  { %4178 = vmatprep.mubr.msk.f32.mxu1 %vm4290_vm1, %v4289_v42 }
0x10c4   :  { %v2396_v31 = vpop.f32.mrf.mxu1 }
0x10c6   :  { %v2323_v32 = vpop.f32.mrf.mxu0  ;;  %v4125_v33 = vpop.f32.mrf.mxu1 }
0x10c7   :  { %4130 = vmatprep.mubr.msk.f32.mxu0 %vm426_vm2, %v2323_v32 }
0x10c8   :  { %v4120_v39 = vpop.f32.mrf.mxu0  ;;  %4131 = vmatmul.mubr.msk.f32.vlgmr.msra.gmra.mxu0 %vm426_vm2, %v2396_v31 }
0x10c9   :  { %4145 = vmatpush3.msra.mxu0 %v3718_v30  ;;  %4152 = vmatprep.mubr.msk.f32.mxu0 %vm83_vm0, %v4744_v36 }
0x10ca   :  { %4146 = vmatprep.subr.mxu0 %v3717_v34 }
0x10cb   :  { %4147 = vmatpush3.msra.mxu0 %v3717_v34 }
0x10cc   :  { %4148 = vmatprep.subr.mxu0 %v3716_v40  ;;  %v4143_v43 = vpop.f32.mrf.mxu1 }
0x10cd   :  { %4149 = vmatpush3.msra.mxu0 %v3716_v40  ;;  %v2577_v59 = vadd.f32 %v4143_v43, %v3712_v56 }
0x10ce   :  { %4150 = vmatprep.subr.mxu0 %v3715_v41  ;;  %v2571_v44 = vpop.f32.mrf.mxu1 }
0x10cf   :  { %4151 = vmatpush3.msra.mxu0 %v3715_v41  ;;  %v2572_v57 = vadd.f32 %v3712_v56, %v2571_v44 }
0x10d0   :  { %4153 = vmatmul.mubr.msk.f32.vlgmr.msra.gmra.mxu0 %vm83_vm0, %v4746_v37  ;;  %4166 = vmatprep.subr.mxu0 %v4289_v42 }
0x10d1   :  { %4168 = vmatprep.mubr.msk.f32.mxu0 %vm4290_vm1, %v4289_v42 }
0x10d4   :  { %v4165_v46 = vpop.f32.mrf.mxu1 }
0x10d5   :  { %v2753_v47 = vadd.f32 %v4165_v46, %v3728_v45 }
0x10d6   :  { %v2747_v48 = vpop.f32.mrf.mxu1 }
0x10d7   :  { %v2748_v49 = vadd.f32 %v3728_v45, %v2747_v48 }
0x10d9   :  { %4177 = vmatpush3.msra.mxu1 %v2748_v49 }
0x10da   :  { %4186 = vmatprep.subr.mxu1 %v3738_v20 }
0x1188   :  { %v4866_v50 = vpop.f32.mrf.mxu0 }
0x1189   :  { %v2491_v27 = vadd.f32 %v4866_v50, %v3706_v26 }
0x118a   :  { %v4868_v51 = vpop.f32.mrf.mxu0 }
0x118b   :  { %v2490_v29 = vadd.f32 %v3706_v26, %v4868_v51  ;;  %v3747_v51 = vld [vmem:[%s5032_s14 + $0x30] sm:$0xff] }
0x1190   :  { %v4154_v52 = vpop.f32.mrf.mxu0 }
0x1191   :  { %v2665_v58 = vadd.f32 %v4154_v52, %v3720_v53  ;;  %v3746_v52 = vld [vmem:[%s5032_s14 + $0x28] sm:$0xff] }
0x1192   :  { %v2659_v54 = vpop.f32.mrf.mxu0 }
0x1193   :  { %v2660_v55 = vadd.f32 %v3720_v53, %v2659_v54  ;;  %v3745_v53 = vld [vmem:[%s5032_s14 + $0x20] sm:$0xff] }
0x1195   :  { %4167 = vmatpush3.xpose.msk.msra.mxu0 %vm426_vm2, %v2660_v55 }
0x1196   :  { %4171 = vmatprep.subr.mxu0 %v4289_v42 }
0x1198   :  { %4169 = vmatmul.mubr.msk.f32.vlgmr.msra.gmra.mxu0 %vm426_vm2, %v2572_v57 }
0x1199   :  { %4172 = vmatpush3.xpose.msk.msra.mxu0 %vm426_vm2, %v2665_v58  ;;  %4173 = vmatprep.mubr.msk.f32.mxu0 %vm4290_vm1, %v4289_v42 }
0x119a   :  { %4181 = vmatprep.subr.mxu0 %v4289_v42 }
0x119c   :  { %4174 = vmatmul.mubr.msk.f32.vlgmr.msra.gmra.mxu0 %vm426_vm2, %v2577_v59 }
0x119d   :  { %4182 = vmatpush3.msra.mxu0 %v2753_v47  ;;  %4183 = vmatprep.mubr.msk.f32.mxu0 %vm4290_vm1, %v4289_v42 }
0x1258   :  { %v2828_v60 = vpop.f32.mrf.mxu0 }
0x1259   :  { %v2829_v61 = vadd.f32 %v2828_v60, %v4521_v4 }
0x125a   :  { %v4170_v38 = vpop.f32.mrf.mxu0 }
0x125b   :  { %v2908_v35 = vsel %vm579_vm3, %v2829_v61, -inf }
0x125c   :  { %2909 = vmax.xlane.f32.xlu0 %v2908_v35  ;;  %v2904_v63 = vpop.f32.mrf.mxu0 }
0x125d   :  { %v2905_v0 = vadd.f32 %v2904_v63, %v4525_v8 }
0x125e   :  { %v4175_v1 = vpop.f32.mrf.mxu0 }
0x125f   :  { %v2911_v3 = vsel %vm579_vm3, %v2905_v0, -inf  ;;  %v3744_v1 = vld [vmem:[%s5034_s13 + $0x1] ss:$0 sm:$0xff] }
0x1260   :  { %2912 = vmax.xlane.f32.xlu1 %v2911_v3 }
0x12e5   :  { %v2910_v5 = vpop.xlane.xlu0 %2909 }
0x12e6   :  { %v2914_v6 = vsub.f32 %v2829_v61, %v2910_v5  ;;  %v3743_v61 = vld [vmem:[%s5033_s12 + $0x1] ss:$0 sm:$0xff] }
0x12e8   :  { %v2916_v7 = vmul.f32 1.442695, %v2914_v6 }
0x12e9   :  { %v2913_v9 = vpop.xlane.xlu1 %2912 }
0x12ea   :  { %4269 = vpow2.f32 %v2916_v7  ;;  %v2915_v10 = vsub.f32 %v2905_v0, %v2913_v9  ;;  %v3760_v7 = vld [vmem:[%s5035_s16 + $0x78] sm:$0xff]  ;;  %v3759_v9 = vld [vmem:[%s5035_s16 + $0x70] sm:$0xff] }
0x12ec   :  { %v2918_v11 = vmul.f32 1.442695, %v2915_v10  ;;  %v3758_v10 = vld [vmem:[%s5035_s16 + $0x68] sm:$0xff] }
0x12ee   :  { %4271 = vpow2.f32 %v2918_v11  ;;  %v3756_v11 = vld [vmem:[%s5035_s16 + $0x58] sm:$0xff] }
0x12f7   :  { %v4270_v4 = vpop.eup %4269 }
0x12f8   :  { %v2920_v12 = vsel %vm579_vm3, %v4270_v4, 0.0 }
0x12f9   :  { %2921 = vadd.xlane.f32.xlu0 %v2920_v12  ;;  %v3754_v12 = vld [vmem:[%s5035_s16 + $0x48] sm:$0xff] }
0x12fb   :  { %v4272_v13 = vpop.eup %4271 }
0x12fc   :  { %v2923_v14 = vsel %vm579_vm3, %v4272_v13, 0.0 }
0x12fd   :  { %2924 = vadd.xlane.f32.xlu1 %v2923_v14  ;;  %v3750_v14 = vld [vmem:[%s5036_s15 + $0x1] ss:$0 sm:$0xff] }
0x1382   :  { %v2922_v8 = vpop.xlane.xlu0 %2921 }
0x1383   :  { %4273 = vrcp.f32 %v2922_v8 }
0x1386   :  { %v2925_v15 = vpop.xlane.xlu1 %2924 }
0x1387   :  { %4275 = vrcp.f32 %v2925_v15 }
0x1390   :  { %v4274_v16 = vpop.eup %4273 }
0x1391   :  { %v2928_v17 = vmul.f32 %v4274_v16, %v4270_v4  ;;  %v3755_v4 = vld [vmem:[%s5035_s16 + $0x50] sm:$0xff] }
0x1393   :  { %4179 = vmatmul.mubr.msk.f32.vlgmr.msra.gmra.mxu1 %vm579_vm3, %v2928_v17 }
0x1394   :  { %v4276_v18 = vpop.eup %4275  ;;  %4187 = vmatpush3.msra.mxu1 %v3738_v20 }
0x1395   :  { %v2929_v19 = vmul.f32 %v4276_v18, %v4272_v13  ;;  %4188 = vmatprep.subr.mxu1 %v3737_v21  ;;  %v3753_v13 = vld [vmem:[%s5035_s16 + $0x40] sm:$0xff] }
0x1396   :  { %4189 = vmatpush3.msra.mxu1 %v3737_v21 }
0x1397   :  { %4184 = vmatmul.mubr.msk.f32.vlgmr.msra.gmra.mxu0 %vm579_vm3, %v2929_v19  ;;  %4204 = vmatprep.subr.mxu1 %v3760_v7 }
0x1453   :  { %v2999_v22 = vpop.f32.mrf.mxu1 }
0x1454   :  { %4190 = vmatprep.mubr.msk.f32.mxu1 %vm426_vm2, %v2999_v22 }
0x1455   :  { %v4180_v23 = vpop.f32.mrf.mxu1 }
0x1457   :  { %v3072_v24 = vpop.f32.mrf.mxu0 }
0x1458   :  { %4191 = vmatmul.mubr.msk.f32.vlgmr.msra.gmra.mxu1 %vm426_vm2, %v3072_v24 }
0x1459   :  { %v4185_v25 = vpop.f32.mrf.mxu0  ;;  %4205 = vmatpush3.msra.mxu1 %v3760_v7 }
0x145a   :  { %4206 = vmatprep.subr.mxu1 %v3759_v9 }
0x145b   :  { %4207 = vmatpush3.msra.mxu1 %v3759_v9 }
0x145c   :  { %4208 = vmatprep.subr.mxu1 %v3758_v10 }
0x145d   :  { %4209 = vmatpush3.msra.mxu1 %v3758_v10 }
0x1518   :  { %v4192_v28 = vpop.f32.mrf.mxu1 }
0x1519   :  { %v3161_v30 = vadd.f32 %v4192_v28, %v2491_v27 }
0x151a   :  { %v3151_v31 = vpop.f32.mrf.mxu1 }
0x151b   :  { %v3160_v32 = vadd.f32 %v3151_v31, %v2490_v29  ;;  %v3163_v33 = vadd.f32 %v3161_v30, %v4746_v37 }
0x151d   :  { %v3171_v34 = vsel %vm83_vm0, %v3163_v33, 0.0  ;;  %v3162_v39 = vadd.f32 %v3160_v32, %v4744_v36  ;;  %v3748_v36 = vld [vmem:[%s5032_s14 + $0x38] sm:$0xff] }
0x151e   :  { %3172 = vadd.xlane.f32.xlu1 %v3171_v34  ;;  %4193 = vmatprep.subr.mxu0 %v3748_v36 }
0x151f   :  { %v3168_v40 = vsel %vm83_vm0, %v3162_v39, 0.0  ;;  %4194 = vmatpush3.msra.mxu0 %v3748_v36 }
0x1520   :  { %3169 = vadd.xlane.f32.xlu0 %v3168_v40  ;;  %4195 = vmatprep.subr.mxu0 %v3747_v51  ;;  %v3762_v40 = vld [vmem:[%s5037_s17 + $0x1] ss:$0 sm:$0xff] }
0x1521   :  { %4196 = vmatpush3.msra.mxu0 %v3747_v51 }
0x1522   :  { %4197 = vmatprep.subr.mxu0 %v3746_v52 }
0x1523   :  { %4198 = vmatpush3.msra.mxu0 %v3746_v52 }
0x1524   :  { %4199 = vmatprep.subr.mxu0 %v3745_v53 }
0x1525   :  { %4200 = vmatpush3.msra.mxu0 %v3745_v53 }
0x15a7   :  { %v3173_v41 = vpop.xlane.xlu1 %3172 }
0x15a8   :  { %v3175_v43 = vmul.f32 0.03125, %v3173_v41 }
0x15a9   :  { %v3170_v44 = vpop.xlane.xlu0 %3169 }
0x15aa   :  { %v3177_v45 = vsub.f32 %v3163_v33, %v3175_v43  ;;  %v3174_v46 = vmul.f32 0.03125, %v3170_v44 }
0x15ac   :  { %v3176_v47 = vsub.f32 %v3162_v39, %v3174_v46  ;;  %v3179_v48 = vmul.f32 %v3177_v45, %v3177_v45 }
0x15ae   :  { %v3183_v49 = vsel %vm83_vm0, %v3179_v48, 0.0  ;;  %v3178_v50 = vmul.f32 %v3176_v47, %v3176_v47 }
0x15af   :  { %3184 = vadd.xlane.f32.xlu1 %v3183_v49 }
0x15b0   :  { %v3180_v37 = vsel %vm83_vm0, %v3178_v50, 0.0 }
0x15b1   :  { %3181 = vadd.xlane.f32.xlu0 %v3180_v37 }
0x1638   :  { %v3185_v54 = vpop.xlane.xlu1 %3184 }
0x1639   :  { %v3187_v55 = vmul.f32 0.03125, %v3185_v54 }
0x163a   :  { %v3182_v56 = vpop.xlane.xlu0 %3181 }
0x163b   :  { %v3189_v57 = vadd.f32 1e-12, %v3187_v55  ;;  %v3186_v58 = vmul.f32 0.03125, %v3182_v56 }
0x163d   :  { %4277 = vrsqrt.f32 %v3189_v57  ;;  %v3188_v59 = vadd.f32 1e-12, %v3186_v58  ;;  %v3475_v58 = vld [vmem:[%s5040_s20 + $0x38] sm:$0xff] }
0x163e   :  { %3519 = vmatprep.subr.mxu0 %v3475_v58 }
0x163f   :  { %4279 = vrsqrt.f32 %v3188_v59  ;;  %v3474_v59 = vld [vmem:[%s5040_s20 + $0x30] sm:$0xff] }
0x164a   :  { %v4278_v60 = vpop.eup %4277 }
0x164b   :  { %v3193_v38 = vmul.f32 %v4278_v60, %v3177_v45  ;;  %v3473_v60 = vld [vmem:[%s5040_s20 + $0x28] sm:$0xff] }
0x164c   :  { %v4280_v35 = vpop.eup %4279 }
0x164d   :  { %v3192_v63 = vmul.f32 %v4280_v35, %v3176_v47  ;;  %v3201_v0 = vmul.f32 %v3743_v61, %v3193_v38  ;;  %v3471_v38 = vld [vmem:[%s5040_s20 + $0x18] sm:$0xff]  ;;  %v3470_v35 = vld [vmem:[%s5040_s20 + $0x10] sm:$0xff] }
0x164f   :  { %v3200_v3 = vmul.f32 %v3743_v61, %v3192_v63  ;;  %v3209_v6 = vadd.f32 %v3744_v1, %v3201_v0  ;;  %v3472_v61 = vld [vmem:[%s5040_s20 + $0x20] sm:$0xff]  ;;  %v3469_v63 = vld [vmem:[%s5040_s20 + $0x8] sm:$0xff] }
0x1650   :  { %v3468_v0 = vld [vmem:[%s5040_s20] sm:$0xff] }
0x1651   :  { %v4931_v5 = vadd.f32 %v3744_v1, %v3200_v3 }
0x1653   :  { %4201 = vmatprep.mubr.msk.f32.mxu0 %vm83_vm0, %v4931_v5 }
0x1654   :  { %4202 = vmatmul.mubr.msk.f32.vlgmr.msra.gmra.mxu0 %vm83_vm0, %v3209_v6 }
0x1655   :  { %3559 = vmatprep.mubr.f32.mxu0 %v4289_v42  ;;  %v3757_v42 = vld [vmem:[%s5035_s16 + $0x60] sm:$0xff]  ;;  %3520 = vmatpush1.msra.mxu0 %v3474_v59 }
0x1656   :  { %4210 = vmatprep.subr.mxu1 %v3757_v42  ;;  %3521 = vmatprep.subr.mxu0 %v3473_v60 }
0x1657   :  { %4211 = vmatpush3.msra.mxu1 %v3757_v42  ;;  %3522 = vmatpush1.msra.mxu0 %v3472_v61  ;;  %v3767_v42 = vld [vmem:[%s5038_s18 + $0x1] ss:$0 sm:$0xff] }
0x1658   :  { %4212 = vmatprep.subr.mxu1 %v3756_v11  ;;  %3523 = vmatprep.subr.mxu0 %v3471_v38 }
0x1659   :  { %4213 = vmatpush3.msra.mxu1 %v3756_v11  ;;  %3524 = vmatpush1.msra.mxu0 %v3470_v35 }
0x165a   :  { %4214 = vmatprep.subr.mxu1 %v3755_v4  ;;  %3525 = vmatprep.subr.mxu0 %v3469_v63 }
0x165b   :  { %4215 = vmatpush3.msra.mxu1 %v3755_v4  ;;  %3526 = vmatpush1.msra.mxu0 %v3468_v0 }
0x165c   :  { %4216 = vmatprep.subr.mxu1 %v3754_v12 }
0x165d   :  { %4217 = vmatpush3.msra.mxu1 %v3754_v12  ;;  %v3768_v12 = vld [vmem:[%s5039_s19 + $0x1] ss:$0 sm:$0xff] }
0x165e   :  { %4218 = vmatprep.subr.mxu1 %v3753_v13 }
0x165f   :  { %4219 = vmatpush3.msra.mxu1 %v3753_v13 }
0x1714   :  { %v4203_v8 = vpop.f32.mrf.mxu0 }
0x1715   :  { %v3301_v15 = vadd.f32 %v4203_v8, %v3750_v14 }
0x1716   :  { %v3295_v16 = vpop.f32.mrf.mxu0 }
0x1717   :  { %v3307_v17 = vmul.f32 0.044715, %v3301_v15  ;;  %v3296_v18 = vadd.f32 %v3750_v14, %v3295_v16  ;;  %v3305_v33 = vmul.f32 0.5, %v3301_v15 }
0x1719   :  { %v3309_v19 = vmul.f32 %v3307_v17, %v3301_v15  ;;  %v3306_v20 = vmul.f32 0.044715, %v3296_v18  ;;  %v3304_v31 = vmul.f32 0.5, %v3296_v18 }
0x171b   :  { %v3311_v21 = vmul.f32 %v3309_v19, %v3301_v15  ;;  %v3308_v22 = vmul.f32 %v3306_v20, %v3296_v18  ;;  %v29_v19 = vstv %s5041_s23  ;;  %v3476_v20 = vld [vmem:[%s5042_s21] sm:$0x3] }
0x171c   :  { %30 = vst [vmem:[#allocation2] sm:$0x1] %v29_v19 }
0x171d   :  { %v3313_v23 = vadd.f32 %v3311_v21, %v3301_v15  ;;  %v3310_v24 = vmul.f32 %v3308_v22, %v3296_v18  ;;  %v3484_v21 = vsub.s32 1, %v4511_v62  ;;  %v3481_v22 = vrot.slane %v3476_v20, %v4518_v2 }
0x171f   :  { %v3315_v25 = vmul.f32 0.7978846, %v3313_v23  ;;  %v3312_v26 = vadd.f32 %v3310_v24, %v3296_v18  ;;  %v3568_v23 = vld [vmem:[%s5043_s22] sm:$0x3]  ;;  %v3485_v24 = vrot.slane %v3476_v20, %v3484_v21 }
0x1721   :  { %4281 = vtanh.f32 %v3315_v25  ;;  %v3314_v27 = vmul.f32 0.7978846, %v3312_v26 }
0x1723   :  { %4283 = vtanh.f32 %v3314_v27  ;;  %v3573_v27 = vrot.slane %v3568_v23, %v4518_v2 }
0x172e   :  { %v4282_v28 = vpop.eup %4281 }
0x172f   :  { %v3319_v30 = vadd.f32 1.0, %v4282_v28 }
0x1730   :  { %v4284_v29 = vpop.eup %4283 }
0x1731   :  { %v3318_v32 = vadd.f32 1.0, %v4284_v29  ;;  %v3321_v39 = vmul.f32 %v3319_v30, %v3305_v33 }
0x1733   :  { %v3320_v34 = vmul.f32 %v3318_v32, %v3304_v31  ;;  %v3577_v31 = vrot.slane %v3568_v23, %v3484_v21 }
0x1735   :  { %4220 = vmatprep.mubr.msk.f32.mxu1 %vm1680_vm4, %v3320_v34 }
0x1736   :  { %4221 = vmatmul.mubr.msk.f32.vlgmr.msra.gmra.mxu1 %vm1680_vm4, %v3321_v39 }
0x17f6   :  { %v4222_v41 = vpop.f32.mrf.mxu1 }
0x17f7   :  { %v3417_v43 = vadd.f32 %v4222_v41, %v3762_v40  ;;  %v4292_v41 = vmov 0  }
0x17f8   :  { %v3411_v44 = vpop.f32.mrf.mxu1  ;;  %4227 = vset.pattern.permute.xlu1 %v4292_v41  ;;  %4228 = vset.pattern.permute.xlu0 %v4292_v41 }
0x17f9   :  { %v3412_v45 = vadd.f32 %v3762_v40, %v3411_v44  ;;  %v3421_v46 = vadd.f32 %v3417_v43, %v3209_v6  ;;  %v3770_v43 = vld [vmem:[#allocation2] ss:$0 sm:$0xff] }
0x17fb   :  { %v3429_v47 = vsel %vm83_vm0, %v3421_v46, 0.0  ;;  %v3420_v48 = vadd.f32 %v3412_v45, %v4931_v5 }
0x17fc   :  { %3430 = vadd.xlane.f32.xlu0 %v3429_v47 }
0x17fd   :  { %v3426_v49 = vsel %vm83_vm0, %v3420_v48, 0.0 }
0x17fe   :  { %3427 = vadd.xlane.f32.xlu1 %v3426_v49 }
0x1885   :  { %v3431_v50 = vpop.xlane.xlu0 %3430 }
0x1886   :  { %v3433_v37 = vmul.f32 0.03125, %v3431_v50 }
0x1887   :  { %v3428_v36 = vpop.xlane.xlu1 %3427 }
0x1888   :  { %v3435_v51 = vsub.f32 %v3421_v46, %v3433_v37  ;;  %v3432_v52 = vmul.f32 0.03125, %v3428_v36 }
0x188a   :  { %v3434_v53 = vsub.f32 %v3420_v48, %v3432_v52  ;;  %v3437_v54 = vmul.f32 %v3435_v51, %v3435_v51 }
0x188c   :  { %v3441_v55 = vsel %vm83_vm0, %v3437_v54, 0.0  ;;  %v3436_v56 = vmul.f32 %v3434_v53, %v3434_v53 }
0x188d   :  { %3442 = vadd.xlane.f32.xlu0 %v3441_v55 }
0x188e   :  { %v3438_v57 = vsel %vm83_vm0, %v3436_v56, 0.0 }
0x188f   :  { %3439 = vadd.xlane.f32.xlu1 %v3438_v57 }
0x1916   :  { %v3443_v1 = vpop.xlane.xlu0 %3442 }
0x1917   :  { %v3445_v3 = vmul.f32 0.03125, %v3443_v1 }
0x1918   :  { %v3440_v5 = vpop.xlane.xlu1 %3439 }
0x1919   :  { %v3447_v6 = vadd.f32 1e-12, %v3445_v3  ;;  %v3444_v7 = vmul.f32 0.03125, %v3440_v5 }
0x191b   :  { %4285 = vrsqrt.f32 %v3447_v6  ;;  %v3446_v9 = vadd.f32 1e-12, %v3444_v7 }
0x191d   :  { %4287 = vrsqrt.f32 %v3446_v9 }
0x1928   :  { %v4286_v10 = vpop.eup %4285 }
0x1929   :  { %v3451_v11 = vmul.f32 %v4286_v10, %v3435_v51 }
0x192a   :  { %v4288_v4 = vpop.eup %4287 }
0x192b   :  { %v3450_v13 = vmul.f32 %v4288_v4, %v3434_v53  ;;  %v3459_v14 = vmul.f32 %v3767_v42, %v3451_v11 }
0x192d   :  { %v3458_v8 = vmul.f32 %v3767_v42, %v3450_v13  ;;  %v3467_v15 = vadd.f32 %v3768_v12, %v3459_v14 }
0x192f   :  { %v3466_v16 = vadd.f32 %v3768_v12, %v3458_v8  ;;  %v3490_v17 = vrot.slane %v3467_v15, 7 }
0x1931   :  { %v3492_v18 = vsel %vm3491_vm5, %v3490_v17, %v3466_v16 }
0x1932   :  { %3769 = vmatmul.mubr.msk.f32.vlgmr.msra.gmra.mxu0 %vm83_vm0, %v3492_v18 }
0x19f2   :  { %v3561_v25 = vpop.f32.mrf.mxu0 }
0x19f3   :  { %v3562_v26 = vadd.f32 %v3561_v25, %v3481_v22 }
0x19f4   :  { %v3563_v28 = vpop.f32.mrf.mxu0 }
0x19f5   :  { %v3566_v29 = vmax.f32 %v3562_v26, 0.0  ;;  %v3564_v30 = vadd.f32 %v3563_v28, %v3485_v24 }
0x19f7   :  { %v3580_v32 = vmul.f32 %v3573_v27, %v3566_v29  ;;  %v3567_v33 = vmax.f32 %v3564_v30, 0.0 }
0x19f9   :  { %v3581_v34 = vmul.f32 %v3577_v31, %v3567_v33  ;;  %v3583_v62 = vsel %vm3582_vm6, %v3580_v32, 0.0 }
0x19fb   :  { %v3584_v39 = vsel %vm3582_vm6, %v3581_v34, 0.0 }
0x19fc   :  { %v3585_v40 = vadd.f32 %v3584_v39, %v3583_v62 }
0x19fe   :  { %3586 = vadd.xlane.f32.xlu0 %v3585_v40 }
0x1a87   :  { %v3587_v44 = vpop.xlane.xlu0 %3586 }
0x1a88   :  { %v3595_v45 = vadd.f32 %v3770_v43, %v3587_v44 }
0x1a8a   :  { %3598 = vperm.xlu1 %4227, %v3595_v45  }
0x1b05   :  { %v3599_v2 = vpop.permute.xlu1 %3598 }
0x1b06   :  { %3601 = vst [vmem:[%s5044_s24] sm:$0x3] %v3599_v2 }

</bundles_post_ra>
